<compile_context>
chip_gen: v6e
topology: v6e:2x2x1
jax: 0.10.0
libtpu: 0.0.40
codegen_flags: <defaults>
</compile_context>

<pallas_src>
import functools

import jax
import jax.numpy as jnp
from jax.experimental import pallas as pl
from jax.experimental.pallas import tpu as pltpu


def _round_up(x, m):
    return ((x + m - 1) // m) * m


def _num_tensorcores():
    """TensorCores hidden behind one JAX device (megacore-style chips like v7x/v4)."""
    try:
        kind = jax.devices()[0].device_kind.lower()
    except Exception:
        return 1
    return 2 if ("7" in kind or "v4" in kind) else 1


def fcnn2_kernel(x_ref, w1_ref, b1_ref, w2_ref, b2_ref, w3_ref, o_ref):
    # Layer 1: (TB, d_in) @ (d_in, H1) in f32 (tiny K; no x cast needed), f32 epilogue.
    h1 = jnp.dot(x_ref[...], w1_ref[...], preferred_element_type=jnp.float32)
    h1 = jnp.maximum(h1 + b1_ref[...], 0.0).astype(jnp.bfloat16)
    # Layer 2: (TB, H1) @ (H1, H2) -- dominant matmul; bf16 operands, f32 accumulation.
    h2 = jnp.dot(h1, w2_ref[...], preferred_element_type=jnp.float32)
    h2 = jnp.maximum(h2 + b2_ref[...], 0.0).astype(jnp.bfloat16)
    # Layer 3 (no bias): (TB, H2) @ (H2, C_pad); lane-dense (128-wide) bf16 store.
    o_ref[...] = jnp.dot(h2, w3_ref[...], preferred_element_type=jnp.float32).astype(o_ref.dtype)


def prepare_fcnn2_params(w1, b1, w2, b2, w3):
    """One-time weight prep (hoisted out of the per-call path).

    Inputs are pre-transposed [in, out]. Returns (params dict, num_classes):
      w1/b1/b2 in f32, w2 in bf16, w3 in bf16 zero-padded to a 128-lane output.
    """
    d_in, h1 = w1.shape
    h1_, h2 = w2.shape
    h2_, n_cls = w3.shape
    assert h1 == h1_ and h2 == h2_, "inconsistent layer shapes"
    n_out_p = _round_up(max(n_cls, 128), 128)
    params = dict(
        w1=jnp.asarray(w1, jnp.float32),
        b1=jnp.asarray(b1, jnp.float32).reshape(1, h1),
        w2=jnp.asarray(w2, jnp.bfloat16),
        b2=jnp.asarray(b2, jnp.float32).reshape(1, h2),
        w3=jnp.zeros((h2, n_out_p), jnp.bfloat16).at[:, :n_cls].set(
            jnp.asarray(w3, jnp.bfloat16)),
    )
    return params, n_cls


@functools.partial(jax.jit, static_argnames=("n_cls", "tb"))
def fcnn2_forward(x, params, n_cls, tb=1024):
    """x: [B, d_in] f32; params from prepare_fcnn2_params. Returns [B, n_cls] f32."""
    w1, b1, w2, b2, w3 = params["w1"], params["b1"], params["w2"], params["b2"], params["w3"]
    B, d_in = x.shape
    assert w1.shape[0] == d_in, "x feature dim must match layer-1 fan-in"
    h1_dim = w1.shape[1]
    h2_dim = w2.shape[1]
    n_out_p = w3.shape[1]

    # Static tiling: >=2 parallel grid steps on dual-TensorCore chips, otherwise as few steps
    # as possible; tile chosen so batch padding stays below one 16-row group (ragged-friendly).
    min_steps = _num_tensorcores() if B >= 32 else 1
    n_steps = max(min_steps, pl.cdiv(B, tb))
    tb_eff = _round_up(max(pl.cdiv(B, n_steps), 8), 16)
    n_steps = pl.cdiv(B, tb_eff)
    b_pad = n_steps * tb_eff

    xp = x if b_pad == B else jnp.zeros((b_pad, d_in), x.dtype).at[:B].set(x)

    # VMEM budget: double-buffered x/out tiles (incl. lane padding), single-buffered weights,
    # h1/h2 intermediates (f32 + bf16 copies) and the layer-3 f32 accumulator, +25% slack.
    vmem_budget = int(1.25 * (
        2 * tb_eff * _round_up(d_in, 128) * 4            # x tiles (f32, double-buffered)
        + 2 * tb_eff * n_out_p * 2                        # out tiles (bf16, double-buffered)
        + _round_up(d_in, 8) * h1_dim * 4                 # W1 (f32)
        + (h1_dim * h2_dim + h2_dim * n_out_p) * 2        # W2 / W3 (bf16)
        + 8 * (h1_dim + h2_dim) * 4                       # biases (sublane-padded)
        + tb_eff * (h1_dim + h2_dim) * (4 + 2)            # h1 / h2 intermediates
        + tb_eff * n_out_p * 4))                          # layer-3 f32 accumulator
    vmem_limit = vmem_budget if vmem_budget > (16 << 20) else None

    single = pl.Buffered(1)  # constant-index weight/bias blocks: no second pipeline buffer
    out_pad = pl.pallas_call(
        fcnn2_kernel,
        out_shape=jax.ShapeDtypeStruct((b_pad, n_out_p), jnp.bfloat16),
        grid_spec=pltpu.PrefetchScalarGridSpec(
            num_scalar_prefetch=0,
            grid=(n_steps,),
            in_specs=[
                pl.BlockSpec((tb_eff, d_in), lambda i: (i, 0)),                          # x tile
                pl.BlockSpec((d_in, h1_dim), lambda i: (0, 0), pipeline_mode=single),    # W1
                pl.BlockSpec((1, h1_dim), lambda i: (0, 0), pipeline_mode=single),       # b1
                pl.BlockSpec((h1_dim, h2_dim), lambda i: (0, 0), pipeline_mode=single),  # W2
                pl.BlockSpec((1, h2_dim), lambda i: (0, 0), pipeline_mode=single),       # b2
                pl.BlockSpec((h2_dim, n_out_p), lambda i: (0, 0), pipeline_mode=single), # W3
            ],
            out_specs=pl.BlockSpec((tb_eff, n_out_p), lambda i: (i, 0)),
        ),
        compiler_params=pltpu.CompilerParams(
            dimension_semantics=("parallel",),
            vmem_limit_bytes=vmem_limit,
        ),
    )(xp, w1, b1, w2, b2, w3)

    return out_pad[:B, :n_cls].astype(jnp.float32)


def reference_forward_f32(x, w1, b1, w2, b2, w3):
    h1 = jnp.maximum(x @ w1 + b1, 0.0)
    h2 = jnp.maximum(h1 @ w2 + b2, 0.0)
    return h2 @ w3


def reference_forward_flow(x, w1, b1, w2, b2, w3):
    # Same dtype flow as the kernel: f32 layer 1, bf16 operands / f32 accumulation for
    # layers 2-3, bf16 output rounding.
    bf = jnp.bfloat16
    h1 = jnp.maximum(jnp.dot(x, w1, preferred_element_type=jnp.float32) + b1, 0.0)
    h2 = jnp.maximum(
        jnp.dot(h1.astype(bf), w2.astype(bf), preferred_element_type=jnp.float32) + b2, 0.0)
    out = jnp.dot(h2.astype(bf), w3.astype(bf), preferred_element_type=jnp.float32)
    return out.astype(bf).astype(jnp.float32)


if __name__ == "__main__":
    # Module defaults: input_dim=4, hidden_dim=[256, 256], num_classes=2.
    input_dim, hidden1, hidden2, num_classes = 4, 256, 256, 2
    batch = 512

    key = jax.random.PRNGKey(0)
    kx, k1, kb1, k2, kb2, k3 = jax.random.split(key, 6)

    x = jax.random.normal(kx, (batch, input_dim), dtype=jnp.float32)

    # PyTorch-like uniform(-1/sqrt(fan_in), 1/sqrt(fan_in)) init, stored pre-transposed [in, out].
    def uinit(k, shape, fan_in):
        bound = 1.0 / jnp.sqrt(jnp.float32(fan_in))
        return jax.random.uniform(k, shape, jnp.float32, -bound, bound)

    w1 = uinit(k1, (input_dim, hidden1), input_dim)
    b1 = uinit(kb1, (1, hidden1), input_dim)
    w2 = uinit(k2, (hidden1, hidden2), hidden1)
    b2 = uinit(kb2, (1, hidden2), hidden1)
    w3 = uinit(k3, (hidden2, num_classes), hidden2)  # layer3 has bias=False

    params, n_cls = prepare_fcnn2_params(w1, b1, w2, b2, w3)  # one-time prep (hoisted)
    out = fcnn2_forward(x, params, n_cls=n_cls, tb=1024)
    out = jax.block_until_ready(out)
    assert out.shape == (batch, num_classes)

    # Matched-dtype-flow reference (tight tolerance) and f32 reference (bf16-rounding tolerance).
    ref_flow = reference_forward_flow(x, w1, b1, w2, b2, w3)
    ref_f32 = reference_forward_f32(x, w1, b1, w2, b2, w3)
    assert jnp.allclose(out, ref_flow, atol=2e-2, rtol=2e-2), "mismatch vs matched-flow reference"
    assert jnp.allclose(out, ref_f32, atol=5e-2, rtol=5e-2), "mismatch vs f32 reference"

    print("KERNEL_OK")
</pallas_src>

<mosaic_0001>
module attributes {stable_mosaic.version = 11 : i64} {
  func.func @fcnn2_kernel(%arg0: i32, %arg1: memref<512x4xf32, #tpu.memory_space<vmem>>, %arg2: memref<4x256xf32, #tpu.memory_space<vmem>>, %arg3: memref<1x256xf32, #tpu.memory_space<vmem>>, %arg4: memref<256x256xbf16, #tpu.memory_space<vmem>>, %arg5: memref<1x256xf32, #tpu.memory_space<vmem>>, %arg6: memref<256x128xbf16, #tpu.memory_space<vmem>>, %arg7: memref<512x128xbf16, #tpu.memory_space<vmem>>) attributes {dimension_semantics = [#tpu.dimension_semantics<parallel>], iteration_bounds = array<i64: 1>, scalar_prefetch = 0 : i64, scratch_operands = 0 : i64, tpu.core_type = #tpu.core_type<tc>, window_params = [{transform_indices = @transform_0, window_bounds = array<i64: 512, 4>}, {pipeline_mode = #tpu.pipeline_mode<synchronous>, transform_indices = @transform_1, window_bounds = array<i64: 4, 256>}, {pipeline_mode = #tpu.pipeline_mode<synchronous>, transform_indices = @transform_2, window_bounds = array<i64: 1, 256>}, {pipeline_mode = #tpu.pipeline_mode<synchronous>, transform_indices = @transform_3, window_bounds = array<i64: 256, 256>}, {pipeline_mode = #tpu.pipeline_mode<synchronous>, transform_indices = @transform_4, window_bounds = array<i64: 1, 256>}, {pipeline_mode = #tpu.pipeline_mode<synchronous>, transform_indices = @transform_5, window_bounds = array<i64: 256, 128>}, {transform_indices = @transform_6, window_bounds = array<i64: 512, 128>}]} {
    %c0 = arith.constant 0 : index
    %c0_0 = arith.constant 0 : index
    %0 = vector.load %arg1[%c0, %c0_0] : memref<512x4xf32, #tpu.memory_space<vmem>>, vector<512x4xf32>
    %c0_1 = arith.constant 0 : index
    %c0_2 = arith.constant 0 : index
    %1 = vector.load %arg2[%c0_1, %c0_2] : memref<4x256xf32, #tpu.memory_space<vmem>>, vector<4x256xf32>
    %cst = arith.constant dense<0.000000e+00> : vector<512x256xf32>
    %2 = tpu.matmul %0, %1, %cst {dimension_numbers = #tpu.dot_dimension_numbers<[1], [0], [0], [1], [0, 0, 1, 1], [], []>} : vector<512x4xf32>, vector<4x256xf32>, vector<512x256xf32> -> vector<512x256xf32>
    %c0_3 = arith.constant 0 : index
    %c0_4 = arith.constant 0 : index
    %3 = vector.load %arg3[%c0_3, %c0_4] : memref<1x256xf32, #tpu.memory_space<vmem>>, vector<1x256xf32>
    %4 = vector.broadcast %3 : vector<1x256xf32> to vector<512x256xf32>
    %5 = arith.addf %2, %4 : vector<512x256xf32>
    %cst_5 = arith.constant 0.000000e+00 : f32
    %6 = vector.broadcast %cst_5 : f32 to vector<512x256xf32>
    %7 = arith.maximumf %5, %6 : vector<512x256xf32>
    %8 = arith.truncf %7 : vector<512x256xf32> to vector<512x256xbf16>
    %c0_6 = arith.constant 0 : index
    %c0_7 = arith.constant 0 : index
    %9 = vector.load %arg4[%c0_6, %c0_7] : memref<256x256xbf16, #tpu.memory_space<vmem>>, vector<256x256xbf16>
    %cst_8 = arith.constant dense<0.000000e+00> : vector<512x256xf32>
    %10 = tpu.matmul %8, %9, %cst_8 {dimension_numbers = #tpu.dot_dimension_numbers<[1], [0], [0], [1], [0, 0, 1, 1], [], []>} : vector<512x256xbf16>, vector<256x256xbf16>, vector<512x256xf32> -> vector<512x256xf32>
    %c0_9 = arith.constant 0 : index
    %c0_10 = arith.constant 0 : index
    %11 = vector.load %arg5[%c0_9, %c0_10] : memref<1x256xf32, #tpu.memory_space<vmem>>, vector<1x256xf32>
    %12 = vector.broadcast %11 : vector<1x256xf32> to vector<512x256xf32>
    %13 = arith.addf %10, %12 : vector<512x256xf32>
    %cst_11 = arith.constant 0.000000e+00 : f32
    %14 = vector.broadcast %cst_11 : f32 to vector<512x256xf32>
    %15 = arith.maximumf %13, %14 : vector<512x256xf32>
    %16 = arith.truncf %15 : vector<512x256xf32> to vector<512x256xbf16>
    %c0_12 = arith.constant 0 : index
    %c0_13 = arith.constant 0 : index
    %17 = vector.load %arg6[%c0_12, %c0_13] : memref<256x128xbf16, #tpu.memory_space<vmem>>, vector<256x128xbf16>
    %cst_14 = arith.constant dense<0.000000e+00> : vector<512x128xf32>
    %18 = tpu.matmul %16, %17, %cst_14 {dimension_numbers = #tpu.dot_dimension_numbers<[1], [0], [0], [1], [0, 0, 1, 1], [], []>} : vector<512x256xbf16>, vector<256x128xbf16>, vector<512x128xf32> -> vector<512x128xf32>
    %19 = arith.truncf %18 : vector<512x128xf32> to vector<512x128xbf16>
    %c0_15 = arith.constant 0 : index
    %c0_16 = arith.constant 0 : index
    %20 = vector.load %arg7[%c0_15, %c0_16] : memref<512x128xbf16, #tpu.memory_space<vmem>>, vector<512x128xbf16>
    tpu.vector_store %arg7[%c0_15, %c0_16], %19 {strides = array<i32>} : memref<512x128xbf16, #tpu.memory_space<vmem>>, vector<512x128xbf16>,
    return
  }
  func.func @transform_0(%arg0: i32) -> (i32, i32) {
    %c0_i32 = arith.constant 0 : i32
    %c0_i32_0 = arith.constant 0 : i32
    return %arg0, %c0_i32 : i32, i32
  }
  func.func @transform_1(%arg0: i32) -> (i32, i32) {
    %c0_i32 = arith.constant 0 : i32
    %c0_i32_0 = arith.constant 0 : i32
    %c0_i32_1 = arith.constant 0 : i32
    return %c0_i32, %c0_i32_0 : i32, i32
  }
  func.func @transform_2(%arg0: i32) -> (i32, i32) {
    %c0_i32 = arith.constant 0 : i32
    %c0_i32_0 = arith.constant 0 : i32
    %c0_i32_1 = arith.constant 0 : i32
    return %c0_i32, %c0_i32_0 : i32, i32
  }
  func.func @transform_3(%arg0: i32) -> (i32, i32) {
    %c0_i32 = arith.constant 0 : i32
    %c0_i32_0 = arith.constant 0 : i32
    %c0_i32_1 = arith.constant 0 : i32
    return %c0_i32, %c0_i32_0 : i32, i32
  }
  func.func @transform_4(%arg0: i32) -> (i32, i32) {
    %c0_i32 = arith.constant 0 : i32
    %c0_i32_0 = arith.constant 0 : i32
    %c0_i32_1 = arith.constant 0 : i32
    return %c0_i32, %c0_i32_0 : i32, i32
  }
  func.func @transform_5(%arg0: i32) -> (i32, i32) {
    %c0_i32 = arith.constant 0 : i32
    %c0_i32_0 = arith.constant 0 : i32
    %c0_i32_1 = arith.constant 0 : i32
    return %c0_i32, %c0_i32_0 : i32, i32
  }
  func.func @transform_6(%arg0: i32) -> (i32, i32) {
    %c0_i32 = arith.constant 0 : i32
    %c0_i32_0 = arith.constant 0 : i32
    return %arg0, %c0_i32 : i32, i32
  }
}

</mosaic_0001>

<bundles_post_ra>
// kernel: fcnn2_forward.1
= control target key start
LH: loop header
LB: loop body
LE: loop exit
PB: predicated region body
PF: predicated region fallthrough
CT: control target
= control target key end

     0   :  { %vm296_vm0 = vcmask 1043456   ;;  %v2934_v1 = vmov 0.0   ;;  %vm103_vm1 = vcmask 31744   ;;  %s4024_s1 = inlined_call_operand.vmem [shape: f32[4,256], index: 1, kind: input, shape index: {}]   ;;  %s4025_s0 = inlined_call_operand.vmem [shape: f32[512,4], index: 0, kind: input, shape index: {}]   ;;  %s4026_s3 = inlined_call_operand.vmem [shape: bf16[256,256], index: 3, kind: input, shape index: {}]   ;;  %s4027_s5 = inlined_call_operand.vmem [shape: bf16[256,128], index: 5, kind: input, shape index: {}]   ;;  %s4028_s2 = inlined_call_operand.vmem [shape: f32[1,256], index: 2, kind: input, shape index: {}]   ;;  %s4029_s4 = inlined_call_operand.vmem [shape: f32[1,256], index: 4, kind: input, shape index: {}]   ;;  %s4030_s6 = inlined_call_operand.vmem [shape: bf16[512,128], index: 6, kind: output, shape index: {}]  }
   0x1   :  { %v88_v0 = vld [vmem:[%s4024_s1] sm:$0xff]  ;;  %365 = vmatprep.mubr.f32.mxu0 %v2934_v1  ;;  %557 = vmatprep.mubr.f32.mxu1 %v2934_v1  ;;  %v25_v4 = vld [vmem:[%s4025_s0 + $0x8] sm:$0xff]  ;;  %v2870_v7 = vld [vmem:[%s4026_s3 + $0x70] ss:$8 sps:$4 sm:$0xff]  }
   0x2   :  { %v102_v2 = vcombine.high %v88_v0, %v88_v0  ;;  %v24_v3 = vld [vmem:[%s4025_s0] sm:$0xff]  ;;  %v57_v6 = vld [vmem:[%s4025_s0 + $0x108] sm:$0xff]  ;;  %v2872_v8 = vld [vmem:[%s4026_s3 + $0x74] ss:$8 sps:$4 sm:$0xff]  }
   0x3   :  { %v56_v5 = vld [vmem:[%s4025_s0 + $0x100] sm:$0xff]  ;;  %v26_v9 = vld [vmem:[%s4025_s0 + $0x10] sm:$0xff]  ;;  %v27_v13 = vld [vmem:[%s4025_s0 + $0x18] sm:$0xff] }
   0x4   :  { %2432 = vmatprep.subr.msk.mxu0 %vm296_vm0, %v102_v2  ;;  %2865 = vmatprep.subr.msk.mxu1 %vm296_vm0, %v102_v2  ;;  %v2875_v10 = vld [vmem:[%s4026_s3 + $0x64] ss:$8 sps:$4 sm:$0xff]   ;;  %v58_v11 = vld [vmem:[%s4025_s0 + $0x110] sm:$0xff]  ;;  %v2873_v12 = vld [vmem:[%s4026_s3 + $0x60] ss:$8 sps:$4 sm:$0xff]  }
   0x5   :  { %2433 = vmatpush1.msk.msra.mxu0 %vm296_vm0, %v88_v0  ;;  %2866 = vmatpush1.msk.msra.mxu1 %vm296_vm0, %v88_v0  ;;  %v2878_v14 = vld [vmem:[%s4026_s3 + $0x54] ss:$8 sps:$4 sm:$0xff]   ;;  %v2876_v16 = vld [vmem:[%s4026_s3 + $0x50] ss:$8 sps:$4 sm:$0xff]   ;;  %v2881_v17 = vld [vmem:[%s4026_s3 + $0x44] ss:$8 sps:$4 sm:$0xff]  }
   0x6   :  { %2434 = vmatmul.mubr.msk.f32.vlgmr.msra.gmra.mxu0 %vm103_vm1, %v24_v3  ;;  %2466 = vmatmul.mubr.msk.f32.vlgmr.msra.gmra.mxu1 %vm103_vm1, %v56_v5  ;;  %v59_v15 = vld [vmem:[%s4025_s0 + $0x118] sm:$0xff]  ;;  %v28_v18 = vld [vmem:[%s4025_s0 + $0x20] sm:$0xff]  ;;  %v29_v22 = vld [vmem:[%s4025_s0 + $0x28] sm:$0xff] }
   0x7   :  { %371 = vmatprep.mubr.f32.mxu0 %v2934_v1  ;;  %563 = vmatprep.mubr.f32.mxu1 %v2934_v1  ;;  %v60_v19 = vld [vmem:[%s4025_s0 + $0x120] sm:$0xff]  ;;  %v2884_v21 = vld [vmem:[%s4026_s3 + $0x34] ss:$8 sps:$4 sm:$0xff]   ;;  %v61_v23 = vld [vmem:[%s4025_s0 + $0x128] sm:$0xff] }
   0x8   :  { %1146 = vmatprep.subr.bf16.mxu1 %v2872_v8  ;;  %v2879_v20 = vld [vmem:[%s4026_s3 + $0x40] ss:$8 sps:$4 sm:$0xff]   ;;  %v2882_v24 = vld [vmem:[%s4026_s3 + $0x30] ss:$8 sps:$4 sm:$0xff]   ;;  %v2887_v25 = vld [vmem:[%s4026_s3 + $0x24] ss:$8 sps:$4 sm:$0xff]  }
   0x9   :  { %1147 = vmatpush1.bf16.msra.mxu1 %v2870_v7  ;;  %v30_v26 = vld [vmem:[%s4025_s0 + $0x30] sm:$0xff]  ;;  %v2885_v28 = vld [vmem:[%s4026_s3 + $0x20] ss:$8 sps:$4 sm:$0xff]   ;;  %v31_v30 = vld [vmem:[%s4025_s0 + $0x38] sm:$0xff] }
   0xa   :  { %2435 = vmatmul.mubr.msk.f32.gmra.mxu0 %vm103_vm1, %v25_v4  ;;  %2467 = vmatmul.mubr.msk.f32.gmra.mxu1 %vm103_vm1, %v57_v6  ;;  %v62_v27 = vld [vmem:[%s4025_s0 + $0x130] sm:$0xff]  ;;  %v63_v31 = vld [vmem:[%s4025_s0 + $0x138] sm:$0xff]  ;;  %v2893_v33 = vld [vmem:[%s4026_s3 + $0x4] ss:$8 sps:$4 sm:$0xff]  }
   0xb   :  { %377 = vmatprep.mubr.f32.mxu0 %v2934_v1  ;;  %569 = vmatprep.mubr.f32.mxu1 %v2934_v1  ;;  %v2890_v29 = vld [vmem:[%s4026_s3 + $0x14] ss:$8 sps:$4 sm:$0xff]   ;;  %v2888_v32 = vld [vmem:[%s4026_s3 + $0x10] ss:$8 sps:$4 sm:$0xff]   ;;  %v32_v34 = vld [vmem:[%s4025_s0 + $0x40] sm:$0xff] }
   0xc   :  { %1148 = vmatprep.subr.bf16.mxu1 %v2875_v10  ;;  %v64_v35 = vld [vmem:[%s4025_s0 + $0x140] sm:$0xff]  ;;  %v2896_v37 = vld [vmem:[%s4026_s3 + $0xf4] ss:$8 sps:$4 sm:$0xff]   ;;  %v33_v38 = vld [vmem:[%s4025_s0 + $0x48] sm:$0xff] }
   0xd   :  { %1149 = vmatpush1.bf16.msra.mxu1 %v2873_v12  ;;  %v2891_v36 = vld [vmem:[%s4026_s3] ss:$8 sps:$4 sm:$0xff]   ;;  %v2894_v40 = vld [vmem:[%s4026_s3 + $0xf0] ss:$8 sps:$4 sm:$0xff]   ;;  %v2899_v41 = vld [vmem:[%s4026_s3 + $0xe4] ss:$8 sps:$4 sm:$0xff]  }
   0xe   :  { %2436 = vmatmul.mubr.msk.f32.gmra.mxu0 %vm103_vm1, %v26_v9  ;;  %2468 = vmatmul.mubr.msk.f32.gmra.mxu1 %vm103_vm1, %v58_v11  ;;  %v65_v39 = vld [vmem:[%s4025_s0 + $0x148] sm:$0xff]  ;;  %v34_v42 = vld [vmem:[%s4025_s0 + $0x50] sm:$0xff]  ;;  %v35_v46 = vld [vmem:[%s4025_s0 + $0x58] sm:$0xff] }
   0xf   :  { %383 = vmatprep.mubr.f32.mxu0 %v2934_v1  ;;  %575 = vmatprep.mubr.f32.mxu1 %v2934_v1  ;;  %v66_v43 = vld [vmem:[%s4025_s0 + $0x150] sm:$0xff]  ;;  %v2897_v44 = vld [vmem:[%s4026_s3 + $0xe0] ss:$8 sps:$4 sm:$0xff]   ;;  %v67_v47 = vld [vmem:[%s4025_s0 + $0x158] sm:$0xff] }
  0x10   :  { %1150 = vmatprep.subr.bf16.mxu1 %v2878_v14  ;;  %v2902_v45 = vld [vmem:[%s4026_s3 + $0xd4] ss:$8 sps:$4 sm:$0xff]   ;;  %v2900_v48 = vld [vmem:[%s4026_s3 + $0xd0] ss:$8 sps:$4 sm:$0xff]   ;;  %v2905_v49 = vld [vmem:[%s4026_s3 + $0xc4] ss:$8 sps:$4 sm:$0xff]  }
  0x11   :  { %1151 = vmatpush1.bf16.msra.mxu1 %v2876_v16  ;;  %v36_v50 = vld [vmem:[%s4025_s0 + $0x60] sm:$0xff]  ;;  %v2908_v53 = vld [vmem:[%s4026_s3 + $0xb4] ss:$8 sps:$4 sm:$0xff]   ;;  %v37_v54 = vld [vmem:[%s4025_s0 + $0x68] sm:$0xff] }
  0x12   :  { %2437 = vmatmul.mubr.msk.f32.gmra.mxu0 %vm103_vm1, %v27_v13  ;;  %2469 = vmatmul.mubr.msk.f32.gmra.mxu1 %vm103_vm1, %v59_v15  ;;  %v68_v51 = vld [vmem:[%s4025_s0 + $0x160] sm:$0xff]  ;;  %v69_v55 = vld [vmem:[%s4025_s0 + $0x168] sm:$0xff]  ;;  %v2906_v56 = vld [vmem:[%s4026_s3 + $0xb0] ss:$8 sps:$4 sm:$0xff]  }
  0x13   :  { %389 = vmatprep.mubr.f32.mxu0 %v2934_v1  ;;  %581 = vmatprep.mubr.f32.mxu1 %v2934_v1  ;;  %v2903_v52 = vld [vmem:[%s4026_s3 + $0xc0] ss:$8 sps:$4 sm:$0xff]   ;;  %v2911_v57 = vld [vmem:[%s4026_s3 + $0xa4] ss:$8 sps:$4 sm:$0xff]   ;;  %v38_v58 = vld [vmem:[%s4025_s0 + $0x70] sm:$0xff] }
  0x14   :  { %1152 = vmatprep.subr.bf16.mxu1 %v2881_v17  ;;  %v70_v59 = vld [vmem:[%s4025_s0 + $0x170] sm:$0xff]  ;;  %v2909_v60 = vld [vmem:[%s4026_s3 + $0xa0] ss:$8 sps:$4 sm:$0xff]   ;;  %v39_v62 = vld [vmem:[%s4025_s0 + $0x78] sm:$0xff] }
  0x15   :  { %1153 = vmatpush1.bf16.msra.mxu1 %v2879_v20  ;;  %v2914_v61 = vld [vmem:[%s4026_s3 + $0x94] ss:$8 sps:$4 sm:$0xff]   ;;  %v2912_v0 = vld [vmem:[%s4026_s3 + $0x90] ss:$8 sps:$4 sm:$0xff]   ;;  %v40_v2 = vld [vmem:[%s4025_s0 + $0x80] sm:$0xff] }
  0x16   :  { %2438 = vmatmul.mubr.msk.f32.gmra.mxu0 %vm103_vm1, %v28_v18  ;;  %2470 = vmatmul.mubr.msk.f32.gmra.mxu1 %vm103_vm1, %v60_v19  ;;  %v71_v63 = vld [vmem:[%s4025_s0 + $0x178] sm:$0xff]  ;;  %v72_v3 = vld [vmem:[%s4025_s0 + $0x180] sm:$0xff]  ;;  %v41_v4 = vld [vmem:[%s4025_s0 + $0x88] sm:$0xff] }
  0x17   :  { %395 = vmatprep.mubr.f32.mxu0 %v2934_v1  ;;  %587 = vmatprep.mubr.f32.mxu1 %v2934_v1  ;;  %v73_v5 = vld [vmem:[%s4025_s0 + $0x188] sm:$0xff]  ;;  %v42_v6 = vld [vmem:[%s4025_s0 + $0x90] sm:$0xff]  ;;  %v43_v9 = vld [vmem:[%s4025_s0 + $0x98] sm:$0xff] }
  0x18   :  { %1154 = vmatprep.subr.bf16.mxu1 %v2884_v21  ;;  %v74_v7 = vld [vmem:[%s4025_s0 + $0x190] sm:$0xff]  ;;  %v2917_v8 = vld [vmem:[%s4026_s3 + $0x84] ss:$8 sps:$4 sm:$0xff]   ;;  %v2915_v10 = vld [vmem:[%s4026_s3 + $0x80] ss:$8 sps:$4 sm:$0xff]  }
  0x19   :  { %1155 = vmatpush1.bf16.msra.mxu1 %v2882_v24  ;;  %v75_v11 = vld [vmem:[%s4025_s0 + $0x198] sm:$0xff]  ;;  %v44_v12 = vld [vmem:[%s4025_s0 + $0xa0] sm:$0xff]  ;;  %v45_v14 = vld [vmem:[%s4025_s0 + $0xa8] sm:$0xff] }
  0x1a   :  { %2439 = vmatmul.mubr.msk.f32.gmra.mxu0 %vm103_vm1, %v29_v22  ;;  %2471 = vmatmul.mubr.msk.f32.gmra.mxu1 %vm103_vm1, %v61_v23  ;;  %v76_v13 = vld [vmem:[%s4025_s0 + $0x1a0] sm:$0xff]  ;;  %v77_v15 = vld [vmem:[%s4025_s0 + $0x1a8] sm:$0xff]  ;;  %v46_v16 = vld [vmem:[%s4025_s0 + $0xb0] sm:$0xff] }
  0x1b   :  { %401 = vmatprep.mubr.f32.mxu0 %v2934_v1  ;;  %593 = vmatprep.mubr.f32.mxu1 %v2934_v1  ;;  %v78_v17 = vld [vmem:[%s4025_s0 + $0x1b0] sm:$0xff]  ;;  %v47_v18 = vld [vmem:[%s4025_s0 + $0xb8] sm:$0xff]  ;;  %v48_v20 = vld [vmem:[%s4025_s0 + $0xc0] sm:$0xff] }
  0x1c   :  { %1156 = vmatprep.subr.bf16.mxu1 %v2887_v25  ;;  %v79_v19 = vld [vmem:[%s4025_s0 + $0x1b8] sm:$0xff]  ;;  %v80_v21 = vld [vmem:[%s4025_s0 + $0x1c0] sm:$0xff]  ;;  %v49_v22 = vld [vmem:[%s4025_s0 + $0xc8] sm:$0xff] }
  0x1d   :  { %1157 = vmatpush1.bf16.msra.mxu1 %v2885_v28  ;;  %v81_v23 = vld [vmem:[%s4025_s0 + $0x1c8] sm:$0xff]  ;;  %v50_v24 = vld [vmem:[%s4025_s0 + $0xd0] sm:$0xff]  ;;  %v52_v28 = vld [vmem:[%s4025_s0 + $0xe0] sm:$0xff] }
  0x1e   :  { %2440 = vmatmul.mubr.msk.f32.gmra.mxu0 %vm103_vm1, %v30_v26  ;;  %2472 = vmatmul.mubr.msk.f32.gmra.mxu1 %vm103_vm1, %v62_v27  ;;  %v82_v25 = vld [vmem:[%s4025_s0 + $0x1d0] sm:$0xff]  ;;  %v51_v26 = vld [vmem:[%s4025_s0 + $0xd8] sm:$0xff] }
  0x1f   :  { %407 = vmatprep.mubr.f32.mxu0 %v2934_v1  ;;  %599 = vmatprep.mubr.f32.mxu1 %v2934_v1  ;;  %v83_v27 = vld [vmem:[%s4025_s0 + $0x1d8] sm:$0xff] }
  0x20   :  { %1158 = vmatprep.subr.bf16.mxu1 %v2890_v29  ;;  %v84_v29 = vld [vmem:[%s4025_s0 + $0x1e0] sm:$0xff] }
  0x21   :  { %1159 = vmatpush1.bf16.msra.mxu1 %v2888_v32  ;;  %v54_v32 = vld [vmem:[%s4025_s0 + $0xf0] sm:$0xff] }
  0x22   :  { %2441 = vmatmul.mubr.msk.f32.gmra.mxu0 %vm103_vm1, %v31_v30  ;;  %2473 = vmatmul.mubr.msk.f32.gmra.mxu1 %vm103_vm1, %v63_v31  ;;  %v53_v30 = vld [vmem:[%s4025_s0 + $0xe8] sm:$0xff] }
  0x23   :  { %413 = vmatprep.mubr.f32.mxu0 %v2934_v1  ;;  %605 = vmatprep.mubr.f32.mxu1 %v2934_v1  ;;  %v85_v31 = vld [vmem:[%s4025_s0 + $0x1e8] sm:$0xff] }
  0x24   :  { %1160 = vmatprep.subr.bf16.mxu1 %v2893_v33  ;;  %v86_v33 = vld [vmem:[%s4025_s0 + $0x1f0] sm:$0xff] }
  0x25   :  { %1161 = vmatpush1.bf16.msra.mxu1 %v2891_v36  ;;  %v2935_v36 = vmov 0  }
  0x26   :  { %2442 = vmatmul.mubr.msk.f32.gmra.mxu0 %vm103_vm1, %v32_v34  ;;  %2474 = vmatmul.mubr.msk.f32.gmra.mxu1 %vm103_vm1, %v64_v35  ;;  %v55_v34 = vld [vmem:[%s4025_s0 + $0xf8] sm:$0xff] }
  0x27   :  { %419 = vmatprep.mubr.f32.mxu0 %v2934_v1  ;;  %611 = vmatprep.mubr.f32.mxu1 %v2934_v1  ;;  %v87_v35 = vld [vmem:[%s4025_s0 + $0x1f8] sm:$0xff] }
  0x28   :  { %1162 = vmatprep.subr.bf16.mxu1 %v2896_v37  ;;  %1819 = vmatprep.subr.bf16.mxu0 %v2935_v36  ;;  %v2918_v37 = vld [vmem:[%s4027_s5 + $0x38] sm:$0xff]  }
  0x29   :  { %1163 = vmatpush2.bf16.msra.mxu1 %v2894_v40  ;;  %1820 = vmatpush1.bf16.msra.mxu0 %v2918_v37  ;;  %v2921_v40 = vld [vmem:[%s4027_s5 + $0x20] sm:$0xff]  }
  0x2a   :  { %2443 = vmatmul.mubr.msk.f32.gmra.mxu0 %vm103_vm1, %v33_v38  ;;  %2475 = vmatmul.mubr.msk.f32.gmra.mxu1 %vm103_vm1, %v65_v39  ;;  %v2920_v38 = vld [vmem:[%s4027_s5 + $0x28] sm:$0xff]   ;;  %v91_v39 = vlaneseq }
  0x2b   :  { %425 = vmatprep.mubr.f32.mxu0 %v2934_v1  ;;  %617 = vmatprep.mubr.f32.mxu1 %v2934_v1 }
  0x2c   :  { %1164 = vmatprep.subr.bf16.mxu1 %v2899_v41  ;;  %1821 = vmatprep.subr.bf16.mxu0 %v2935_v36  ;;  %v3406_v41 = vshrl.u32 %v91_v39, 7 }
  0x2d   :  { %1165 = vmatpush2.bf16.msra.mxu1 %v2897_v44  ;;  %v89_v44 = vld [vmem:[%s4028_s2] sm:$0x3] }
  0x2e   :  { %2444 = vmatmul.mubr.msk.f32.gmra.mxu0 %vm103_vm1, %v34_v42  ;;  %2476 = vmatmul.mubr.msk.f32.gmra.mxu1 %vm103_vm1, %v66_v43  ;;  %v4032_v42 = vsub.s32 1, %v3406_v41  ;;  %v4031_v43 = vsub.s32 0, %v3406_v41 }
  0x2f   :  { %431 = vmatprep.mubr.f32.mxu0 %v2934_v1  ;;  %623 = vmatprep.mubr.f32.mxu1 %v2934_v1 }
  0x30   :  { %1166 = vmatprep.subr.bf16.mxu1 %v2902_v45 }
  0x31   :  { %1167 = vmatpush2.bf16.msra.mxu1 %v2900_v48  ;;  %v3423_v48 = vrot.slane %v89_v44, %v4031_v43 }
  0x32   :  { %2445 = vmatmul.mubr.msk.f32.gmra.mxu0 %vm103_vm1, %v35_v46  ;;  %2477 = vmatmul.mubr.msk.f32.gmra.mxu1 %vm103_vm1, %v67_v47  ;;  %v3416_v46 = vrot.slane %v89_v44, %v4032_v42  ;;  %v2922_v47 = vld [vmem:[%s4027_s5 + $0x18] sm:$0xff]  }
  0x33   :  { %437 = vmatprep.mubr.f32.mxu0 %v2934_v1  ;;  %629 = vmatprep.mubr.f32.mxu1 %v2934_v1 }
  0x34   :  { %1168 = vmatprep.subr.bf16.mxu1 %v2905_v49 }
  0x35   :  { %1169 = vmatpush2.bf16.msra.mxu1 %v2903_v52 }
  0x36   :  { %2446 = vmatmul.mubr.msk.f32.gmra.mxu0 %vm103_vm1, %v36_v50  ;;  %2478 = vmatmul.mubr.msk.f32.gmra.mxu1 %vm103_vm1, %v68_v51  ;;  %v2923_v51 = vld [vmem:[%s4027_s5 + $0x10] sm:$0xff]  }
  0x37   :  { %443 = vmatprep.mubr.f32.mxu0 %v2934_v1  ;;  %635 = vmatprep.mubr.f32.mxu1 %v2934_v1 }
  0x38   :  { %1170 = vmatprep.subr.bf16.mxu1 %v2908_v53 }
  0x39   :  { %1171 = vmatpush2.bf16.msra.mxu1 %v2906_v56 }
  0x3a   :  { %2447 = vmatmul.mubr.msk.f32.gmra.mxu0 %vm103_vm1, %v37_v54  ;;  %2479 = vmatmul.mubr.msk.f32.gmra.mxu1 %vm103_vm1, %v69_v55 }
  0x3b   :  { %449 = vmatprep.mubr.f32.mxu0 %v2934_v1  ;;  %641 = vmatprep.mubr.f32.mxu1 %v2934_v1 }
  0x3c   :  { %1172 = vmatprep.subr.bf16.mxu1 %v2911_v57 }
  0x3d   :  { %1173 = vmatpush2.bf16.msra.mxu1 %v2909_v60  ;;  %v2924_v60 = vld [vmem:[%s4027_s5 + $0x8] sm:$0xff]  }
  0x3e   :  { %2448 = vmatmul.mubr.msk.f32.gmra.mxu0 %vm103_vm1, %v38_v58  ;;  %2480 = vmatmul.mubr.msk.f32.gmra.mxu1 %vm103_vm1, %v70_v59 }
  0x3f   :  { %455 = vmatprep.mubr.f32.mxu0 %v2934_v1  ;;  %647 = vmatprep.mubr.f32.mxu1 %v2934_v1 }
  0x40   :  { %1174 = vmatprep.subr.bf16.mxu1 %v2914_v61 }
  0x41   :  { %1175 = vmatpush2.bf16.msra.mxu1 %v2912_v0 }
  0x42   :  { %2449 = vmatmul.mubr.msk.f32.gmra.mxu0 %vm103_vm1, %v39_v62  ;;  %2481 = vmatmul.mubr.msk.f32.gmra.mxu1 %vm103_vm1, %v71_v63 }
  0x43   :  { %461 = vmatprep.mubr.f32.mxu0 %v2934_v1  ;;  %653 = vmatprep.mubr.f32.mxu1 %v2934_v1 }
  0x44   :  { %1176 = vmatprep.subr.bf16.mxu1 %v2917_v8 }
  0x45   :  { %1177 = vmatpush2.bf16.msra.mxu1 %v2915_v10 }
  0x46   :  { %2450 = vmatmul.mubr.msk.f32.gmra.mxu0 %vm103_vm1, %v40_v2  ;;  %2482 = vmatmul.mubr.msk.f32.gmra.mxu1 %vm103_vm1, %v72_v3 }
  0x47   :  { %467 = vmatprep.mubr.f32.mxu0 %v2934_v1  ;;  %659 = vmatprep.mubr.f32.mxu1 %v2934_v1 }
  0x4a   :  { %2451 = vmatmul.mubr.msk.f32.gmra.mxu0 %vm103_vm1, %v41_v4  ;;  %2483 = vmatmul.mubr.msk.f32.gmra.mxu1 %vm103_vm1, %v73_v5 }
  0x4b   :  { %473 = vmatprep.mubr.f32.mxu0 %v2934_v1  ;;  %665 = vmatprep.mubr.f32.mxu1 %v2934_v1 }
  0x4e   :  { %2452 = vmatmul.mubr.msk.f32.gmra.mxu0 %vm103_vm1, %v42_v6  ;;  %2484 = vmatmul.mubr.msk.f32.gmra.mxu1 %vm103_vm1, %v74_v7 }
  0x4f   :  { %479 = vmatprep.mubr.f32.mxu0 %v2934_v1  ;;  %671 = vmatprep.mubr.f32.mxu1 %v2934_v1 }
  0x52   :  { %2453 = vmatmul.mubr.msk.f32.gmra.mxu0 %vm103_vm1, %v43_v9  ;;  %2485 = vmatmul.mubr.msk.f32.gmra.mxu1 %vm103_vm1, %v75_v11 }
  0x53   :  { %485 = vmatprep.mubr.f32.mxu0 %v2934_v1  ;;  %677 = vmatprep.mubr.f32.mxu1 %v2934_v1 }
  0x56   :  { %2454 = vmatmul.mubr.msk.f32.gmra.mxu0 %vm103_vm1, %v44_v12  ;;  %2486 = vmatmul.mubr.msk.f32.gmra.mxu1 %vm103_vm1, %v76_v13 }
  0x57   :  { %491 = vmatprep.mubr.f32.mxu0 %v2934_v1  ;;  %683 = vmatprep.mubr.f32.mxu1 %v2934_v1 }
  0x5a   :  { %2455 = vmatmul.mubr.msk.f32.gmra.mxu0 %vm103_vm1, %v45_v14  ;;  %2487 = vmatmul.mubr.msk.f32.gmra.mxu1 %vm103_vm1, %v77_v15 }
  0x5b   :  { %497 = vmatprep.mubr.f32.mxu0 %v2934_v1  ;;  %689 = vmatprep.mubr.f32.mxu1 %v2934_v1 }
  0x5e   :  { %2456 = vmatmul.mubr.msk.f32.gmra.mxu0 %vm103_vm1, %v46_v16  ;;  %2488 = vmatmul.mubr.msk.f32.gmra.mxu1 %vm103_vm1, %v78_v17  ;;  %v2925_v16 = vld [vmem:[%s4027_s5] sm:$0xff]  }
  0x5f   :  { %503 = vmatprep.mubr.f32.mxu0 %v2934_v1  ;;  %695 = vmatprep.mubr.f32.mxu1 %v2934_v1 }
  0x62   :  { %2457 = vmatmul.mubr.msk.f32.gmra.mxu0 %vm103_vm1, %v47_v18  ;;  %2489 = vmatmul.mubr.msk.f32.gmra.mxu1 %vm103_vm1, %v79_v19 }
  0x63   :  { %509 = vmatprep.mubr.f32.mxu0 %v2934_v1  ;;  %701 = vmatprep.mubr.f32.mxu1 %v2934_v1 }
  0x66   :  { %2458 = vmatmul.mubr.msk.f32.gmra.mxu0 %vm103_vm1, %v48_v20  ;;  %2490 = vmatmul.mubr.msk.f32.gmra.mxu1 %vm103_vm1, %v80_v21 }
  0x67   :  { %515 = vmatprep.mubr.f32.mxu0 %v2934_v1  ;;  %707 = vmatprep.mubr.f32.mxu1 %v2934_v1 }
  0x6a   :  { %2459 = vmatmul.mubr.msk.f32.gmra.mxu0 %vm103_vm1, %v49_v22  ;;  %2491 = vmatmul.mubr.msk.f32.gmra.mxu1 %vm103_vm1, %v81_v23 }
  0x6b   :  { %521 = vmatprep.mubr.f32.mxu0 %v2934_v1  ;;  %713 = vmatprep.mubr.f32.mxu1 %v2934_v1 }
  0x6e   :  { %2460 = vmatmul.mubr.msk.f32.gmra.mxu0 %vm103_vm1, %v50_v24  ;;  %2492 = vmatmul.mubr.msk.f32.gmra.mxu1 %vm103_vm1, %v82_v25 }
  0x6f   :  { %527 = vmatprep.mubr.f32.mxu0 %v2934_v1  ;;  %719 = vmatprep.mubr.f32.mxu1 %v2934_v1 }
  0x72   :  { %2461 = vmatmul.mubr.msk.f32.gmra.mxu0 %vm103_vm1, %v51_v26  ;;  %2493 = vmatmul.mubr.msk.f32.gmra.mxu1 %vm103_vm1, %v83_v27 }
  0x73   :  { %533 = vmatprep.mubr.f32.mxu0 %v2934_v1  ;;  %725 = vmatprep.mubr.f32.mxu1 %v2934_v1 }
  0x76   :  { %2462 = vmatmul.mubr.msk.f32.gmra.mxu0 %vm103_vm1, %v52_v28  ;;  %2494 = vmatmul.mubr.msk.f32.gmra.mxu1 %vm103_vm1, %v84_v29 }
  0x77   :  { %539 = vmatprep.mubr.f32.mxu0 %v2934_v1  ;;  %731 = vmatprep.mubr.f32.mxu1 %v2934_v1 }
  0x7a   :  { %2463 = vmatmul.mubr.msk.f32.gmra.mxu0 %vm103_vm1, %v53_v30  ;;  %2495 = vmatmul.mubr.msk.f32.gmra.mxu1 %vm103_vm1, %v85_v31 }
  0x7b   :  { %545 = vmatprep.mubr.f32.mxu0 %v2934_v1  ;;  %737 = vmatprep.mubr.f32.mxu1 %v2934_v1 }
  0x7e   :  { %2464 = vmatmul.mubr.msk.f32.gmra.mxu0 %vm103_vm1, %v54_v32  ;;  %2496 = vmatmul.mubr.msk.f32.gmra.mxu1 %vm103_vm1, %v86_v33 }
  0x7f   :  { %551 = vmatprep.mubr.f32.mxu0 %v2934_v1  ;;  %743 = vmatprep.mubr.f32.mxu1 %v2934_v1  ;;  %v2919_v1 = vld [vmem:[%s4027_s5 + $0x30] sm:$0xff]  }
  0x80   :  { %1822 = vmatpush1.bf16.msra.mxu0 %v2919_v1 }
  0x81   :  { %1823 = vmatprep.subr.bf16.mxu0 %v2935_v36 }
  0x82   :  { %2465 = vmatmul.mubr.msk.f32.gmra.mxu0 %vm103_vm1, %v55_v34  ;;  %2497 = vmatmul.mubr.msk.f32.gmra.mxu1 %vm103_vm1, %v87_v35  ;;  %v2926_v35 = vld [vmem:[%s4027_s5 + $0x78] sm:$0xff]  }
  0x84   :  { %1824 = vmatpush1.bf16.msra.mxu0 %v2920_v38 }
  0x85   :  { %1825 = vmatprep.subr.bf16.mxu0 %v2935_v36 }
  0x88   :  { %1826 = vmatpush1.bf16.msra.mxu0 %v2921_v40 }
  0x89   :  { %1827 = vmatprep.subr.bf16.mxu0 %v2935_v36 }
  0x8c   :  { %1828 = vmatpush1.bf16.msra.mxu0 %v2922_v47 }
  0x8d   :  { %1829 = vmatprep.subr.bf16.mxu0 %v2935_v36 }
  0x90   :  { %1830 = vmatpush1.bf16.msra.mxu0 %v2923_v51 }
  0x91   :  { %1831 = vmatprep.subr.bf16.mxu0 %v2935_v36 }
  0x94   :  { %1832 = vmatpush1.bf16.msra.mxu0 %v2924_v60 }
  0x95   :  { %1833 = vmatprep.subr.bf16.mxu0 %v2935_v36 }
  0x98   :  { %1834 = vmatpush1.bf16.msra.mxu0 %v2925_v16 }
  0x99   :  { %1835 = vmatprep.subr.bf16.mxu0 %v2935_v36 }
  0x9c   :  { %1836 = vmatpush2.bf16.msra.mxu0 %v2926_v35 }
  0x9d   :  { %1837 = vmatprep.subr.bf16.mxu0 %v2935_v36 }
  0xc6   :  { %v367_v45 = vpop.f32.mrf.mxu0  ;;  %v3425_v50 = vpop.f32.mrf.mxu1 }
  0xc7   :  { %v368_v56 = vadd.f32 %v367_v45, %v3423_v48 }
  0xc8   :  { %v369_v49 = vpop.f32.mrf.mxu0  ;;  %v3430_v53 = vpop.f32.mrf.mxu1 }
  0xc9   :  { %v370_v54 = vadd.f32 %v369_v49, %v3416_v46  ;;  %v750_v3 = vmax.f32 %v368_v56, 0.0 }
  0xca   :  { %v373_v52 = vpop.f32.mrf.mxu0  ;;  %v3436_v58 = vpop.f32.mrf.mxu1 }
  0xcb   :  { %v374_v55 = vadd.f32 %v373_v52, %v3423_v48  ;;  %v751_v0 = vmax.f32 %v370_v54, 0.0 }
  0xcc   :  { %v375_v57 = vpop.f32.mrf.mxu0  ;;  %v3442_v63 = vpop.f32.mrf.mxu1 }
  0xcd   :  { %v376_v59 = vadd.f32 %v375_v57, %v3416_v46  ;;  %v752_v61 = vmax.f32 %v374_v55, 0.0 }
  0xce   :  { %v379_v62 = vpop.f32.mrf.mxu0  ;;  %v3445_v5 = vpop.f32.mrf.mxu1 }
  0xcf   :  { %v753_v2 = vmax.f32 %v376_v59, 0.0  ;;  %v878_v7 = vpack.c.bf16 %v752_v61, %v750_v3  ;;  %v380_v12 = vadd.f32 %v379_v62, %v3423_v48  ;;  %v2927_v62 = vld [vmem:[%s4027_s5 + $0x70] sm:$0xff]  }
  0xd0   :  { %v381_v4 = vpop.f32.mrf.mxu0  ;;  %v3447_v9 = vpop.f32.mrf.mxu1  ;;  %1838 = vmatpush2.bf16.msra.mxu0 %v2927_v62 }
  0xd1   :  { %v879_v6 = vpack.c.bf16 %v753_v2, %v751_v0  ;;  %v382_v10 = vadd.f32 %v381_v4, %v3416_v46  ;;  %v754_v22 = vmax.f32 %v380_v12, 0.0  ;;  %1839 = vmatprep.subr.bf16.mxu0 %v2935_v36 }
  0xd2   :  { %v385_v8 = vpop.f32.mrf.mxu0  ;;  %v3453_v14 = vpop.f32.mrf.mxu1 }
  0xd3   :  { %v386_v11 = vadd.f32 %v385_v8, %v3423_v48  ;;  %1178 = vmatprep.mubr.bf16.mxu1 %v879_v6  ;;  %v755_v20 = vmax.f32 %v382_v10, 0.0 }
  0xd4   :  { %v387_v13 = vpop.f32.mrf.mxu0  ;;  %1179 = vmatmul.mubr.bf16.vlgmr.msra.gmra.mxu1 %v878_v7  ;;  %v3459_v19 = vpop.f32.mrf.mxu1 }
  0xd5   :  { %v388_v15 = vadd.f32 %v387_v13, %v3416_v46  ;;  %v756_v17 = vmax.f32 %v386_v11, 0.0 }
  0xd6   :  { %v391_v18 = vpop.f32.mrf.mxu0  ;;  %v3461_v24 = vpop.f32.mrf.mxu1 }
  0xd7   :  { %v757_v21 = vmax.f32 %v388_v15, 0.0  ;;  %v880_v26 = vpack.c.bf16 %v756_v17, %v754_v22  ;;  %v392_v31 = vadd.f32 %v391_v18, %v3423_v48 }
  0xd8   :  { %v393_v23 = vpop.f32.mrf.mxu0  ;;  %v3464_v28 = vpop.f32.mrf.mxu1 }
  0xd9   :  { %v881_v25 = vpack.c.bf16 %v757_v21, %v755_v20  ;;  %v394_v29 = vadd.f32 %v393_v23, %v3416_v46  ;;  %v758_v44 = vmax.f32 %v392_v31, 0.0  ;;  %v2928_v23 = vld [vmem:[%s4027_s5 + $0x68] sm:$0xff]  }
  0xda   :  { %v397_v27 = vpop.f32.mrf.mxu0  ;;  %v3469_v33 = vpop.f32.mrf.mxu1  ;;  %1840 = vmatpush2.bf16.msra.mxu0 %v2928_v23 }
  0xdb   :  { %v398_v30 = vadd.f32 %v397_v27, %v3423_v48  ;;  %1188 = vmatprep.mubr.bf16.mxu1 %v881_v25  ;;  %v759_v39 = vmax.f32 %v394_v29, 0.0  ;;  %1841 = vmatprep.subr.bf16.mxu0 %v2935_v36 }
  0xdc   :  { %v399_v32 = vpop.f32.mrf.mxu0  ;;  %1189 = vmatmul.mubr.bf16.gmra.mxu1 %v880_v26  ;;  %v3475_v38 = vpop.f32.mrf.mxu1 }
  0xdd   :  { %v400_v34 = vadd.f32 %v399_v32, %v3416_v46  ;;  %v760_v37 = vmax.f32 %v398_v30, 0.0 }
  0xde   :  { %v403_v1 = vpop.f32.mrf.mxu0  ;;  %v3477_v47 = vpop.f32.mrf.mxu1 }
  0xdf   :  { %v761_v40 = vmax.f32 %v400_v34, 0.0  ;;  %v882_v51 = vpack.c.bf16 %v760_v37, %v758_v44  ;;  %v404_v57 = vadd.f32 %v403_v1, %v3423_v48 }
  0xe0   :  { %v405_v45 = vpop.f32.mrf.mxu0  ;;  %v3480_v54 = vpop.f32.mrf.mxu1 }
  0xe1   :  { %v883_v49 = vpack.c.bf16 %v761_v40, %v759_v39  ;;  %v406_v55 = vadd.f32 %v405_v45, %v3416_v46  ;;  %v762_v7 = vmax.f32 %v404_v57, 0.0 }
  0xe2   :  { %v409_v52 = vpop.f32.mrf.mxu0  ;;  %v3485_v60 = vpop.f32.mrf.mxu1 }
  0xe3   :  { %v410_v56 = vadd.f32 %v409_v52, %v3423_v48  ;;  %1198 = vmatprep.mubr.bf16.mxu1 %v883_v49  ;;  %v763_v4 = vmax.f32 %v406_v55, 0.0  ;;  %v2929_v55 = vld [vmem:[%s4027_s5 + $0x60] sm:$0xff]  }
  0xe4   :  { %v411_v59 = vpop.f32.mrf.mxu0  ;;  %1199 = vmatmul.mubr.bf16.gmra.mxu1 %v882_v51  ;;  %v3491_v3 = vpop.f32.mrf.mxu1  ;;  %1842 = vmatpush2.bf16.msra.mxu0 %v2929_v55  ;;  %v2931_v55 = vld [vmem:[%s4027_s5 + $0x50] sm:$0xff]  }
  0xe5   :  { %v412_v61 = vadd.f32 %v411_v59, %v3416_v46  ;;  %v764_v0 = vmax.f32 %v410_v56, 0.0  ;;  %1843 = vmatprep.subr.bf16.mxu0 %v2935_v36 }
  0xe6   :  { %v415_v2 = vpop.f32.mrf.mxu0  ;;  %v3493_v10 = vpop.f32.mrf.mxu1 }
  0xe7   :  { %v765_v6 = vmax.f32 %v412_v61, 0.0  ;;  %v884_v12 = vpack.c.bf16 %v764_v0, %v762_v7  ;;  %v416_v18 = vadd.f32 %v415_v2, %v3423_v48 }
  0xe8   :  { %v417_v8 = vpop.f32.mrf.mxu0  ;;  %v3496_v15 = vpop.f32.mrf.mxu1 }
  0xe9   :  { %v885_v11 = vpack.c.bf16 %v765_v6, %v763_v4  ;;  %v418_v16 = vadd.f32 %v417_v8, %v3416_v46  ;;  %v766_v31 = vmax.f32 %v416_v18, 0.0 }
  0xea   :  { %v421_v13 = vpop.f32.mrf.mxu0  ;;  %v3501_v21 = vpop.f32.mrf.mxu1 }
  0xeb   :  { %v422_v17 = vadd.f32 %v421_v13, %v3423_v48  ;;  %1208 = vmatprep.mubr.bf16.mxu1 %v885_v11  ;;  %v767_v29 = vmax.f32 %v418_v16, 0.0 }
  0xec   :  { %v423_v20 = vpop.f32.mrf.mxu0  ;;  %1209 = vmatmul.mubr.bf16.gmra.mxu1 %v884_v12  ;;  %v3507_v27 = vpop.f32.mrf.mxu1 }
  0xed   :  { %v424_v22 = vadd.f32 %v423_v20, %v3416_v46  ;;  %v768_v25 = vmax.f32 %v422_v17, 0.0  ;;  %v2930_v20 = vld [vmem:[%s4027_s5 + $0x58] sm:$0xff]  }
  0xee   :  { %v427_v26 = vpop.f32.mrf.mxu0  ;;  %v3509_v34 = vpop.f32.mrf.mxu1  ;;  %1844 = vmatpush2.bf16.msra.mxu0 %v2930_v20 }
  0xef   :  { %v769_v30 = vmax.f32 %v424_v22, 0.0  ;;  %v886_v37 = vpack.c.bf16 %v768_v25, %v766_v31  ;;  %v428_v45 = vadd.f32 %v427_v26, %v3423_v48  ;;  %1845 = vmatprep.subr.bf16.mxu0 %v2935_v36 }
  0xf0   :  { %v429_v32 = vpop.f32.mrf.mxu0  ;;  %v3512_v39 = vpop.f32.mrf.mxu1 }
  0xf1   :  { %v887_v35 = vpack.c.bf16 %v769_v30, %v767_v29  ;;  %v430_v40 = vadd.f32 %v429_v32, %v3416_v46  ;;  %v770_v0 = vmax.f32 %v428_v45, 0.0 }
  0xf2   :  { %v433_v1 = vpop.f32.mrf.mxu0  ;;  %v3517_v51 = vpop.f32.mrf.mxu1  ;;  %1846 = vmatpush2.bf16.msra.mxu0 %v2931_v55 }
  0xf3   :  { %v434_v44 = vadd.f32 %v433_v1, %v3423_v48  ;;  %1218 = vmatprep.mubr.bf16.mxu1 %v887_v35  ;;  %v771_v61 = vmax.f32 %v430_v40, 0.0  ;;  %1847 = vmatprep.subr.bf16.mxu0 %v2935_v36 }
  0xf4   :  { %v435_v49 = vpop.f32.mrf.mxu0  ;;  %1219 = vmatmul.mubr.bf16.gmra.mxu1 %v886_v37  ;;  %v3523_v59 = vpop.f32.mrf.mxu1 }
  0xf5   :  { %v436_v52 = vadd.f32 %v435_v49, %v3416_v46  ;;  %v772_v56 = vmax.f32 %v434_v44, 0.0 }
  0xf6   :  { %v439_v57 = vpop.f32.mrf.mxu0  ;;  %v3525_v4 = vpop.f32.mrf.mxu1 }
  0xf7   :  { %v773_v62 = vmax.f32 %v436_v52, 0.0  ;;  %v888_v7 = vpack.c.bf16 %v772_v56, %v770_v0  ;;  %v440_v16 = vadd.f32 %v439_v57, %v3423_v48 }
  0xf8   :  { %v441_v2 = vpop.f32.mrf.mxu0  ;;  %v3528_v11 = vpop.f32.mrf.mxu1 }
  0xf9   :  { %v889_v6 = vpack.c.bf16 %v773_v62, %v771_v61  ;;  %v442_v12 = vadd.f32 %v441_v2, %v3416_v46  ;;  %v774_v30 = vmax.f32 %v440_v16, 0.0 }
  0xfa   :  { %v445_v8 = vpop.f32.mrf.mxu0  ;;  %v3537_v25 = vpop.f32.mrf.mxu1 }
  0xfb   :  { %v446_v13 = vadd.f32 %v445_v8, %v3423_v48  ;;  %1228 = vmatprep.mubr.bf16.mxu1 %v889_v6  ;;  %v775_v26 = vmax.f32 %v442_v12, 0.0 }
  0xfc   :  { %v447_v17 = vpop.f32.mrf.mxu0  ;;  %1229 = vmatmul.mubr.bf16.gmra.mxu1 %v888_v7  ;;  %v3540_v1 = vpop.f32.mrf.mxu1 }
  0xfd   :  { %v448_v18 = vadd.f32 %v447_v17, %v3416_v46  ;;  %v776_v22 = vmax.f32 %v446_v13, 0.0 }
  0xfe   :  { %v451_v23 = vpop.f32.mrf.mxu0  ;;  %v3549_v61 = vpop.f32.mrf.mxu1 }
  0xff   :  { %v777_v29 = vmax.f32 %v448_v18, 0.0  ;;  %v890_v35 = vpack.c.bf16 %v776_v22, %v774_v30  ;;  %v452_v45 = vadd.f32 %v451_v23, %v3423_v48  ;;  %v2932_v23 = vld [vmem:[%s4027_s5 + $0x48] sm:$0xff]  }
 0x100   :  { %v453_v31 = vpop.f32.mrf.mxu0  ;;  %v3552_v13 = vpop.f32.mrf.mxu1  ;;  %1848 = vmatpush2.bf16.msra.mxu0 %v2932_v23 }
 0x101   :  { %v891_v32 = vpack.c.bf16 %v777_v29, %v775_v26  ;;  %v454_v40 = vadd.f32 %v453_v31, %v3416_v46  ;;  %v778_v2 = vmax.f32 %v452_v45, 0.0  ;;  %1849 = vmatprep.subr.bf16.mxu0 %v2935_v36 }
 0x102   :  { %v457_v37 = vpop.f32.mrf.mxu0  ;;  %v3561_v30 = vpop.f32.mrf.mxu1 }
 0x103   :  { %v458_v44 = vadd.f32 %v457_v37, %v3423_v48  ;;  %1238 = vmatprep.mubr.bf16.mxu1 %v891_v32  ;;  %v779_v62 = vmax.f32 %v454_v40, 0.0 }
 0x104   :  { %v459_v49 = vpop.f32.mrf.mxu0  ;;  %1239 = vmatmul.mubr.bf16.gmra.mxu1 %v890_v35 }
 0x105   :  { %v460_v52 = vadd.f32 %v459_v49, %v3416_v46  ;;  %v780_v56 = vmax.f32 %v458_v44, 0.0  ;;  %v3564_v49 = vpop.f32.mrf.mxu1 }
 0x106   :  { %v463_v57 = vpop.f32.mrf.mxu0 }
 0x107   :  { %v781_v0 = vmax.f32 %v460_v52, 0.0  ;;  %v892_v8 = vpack.c.bf16 %v780_v56, %v778_v2  ;;  %v464_v18 = vadd.f32 %v463_v57, %v3423_v48 }
 0x108   :  { %v465_v6 = vpop.f32.mrf.mxu0 }
 0x109   :  { %v893_v7 = vpack.c.bf16 %v781_v0, %v779_v62  ;;  %v466_v16 = vadd.f32 %v465_v6, %v3416_v46  ;;  %v782_v35 = vmax.f32 %v464_v18, 0.0  ;;  %v3570_v6 = vpop.f32.mrf.mxu1 }
 0x10a   :  { %v469_v12 = vpop.f32.mrf.mxu0 }
 0x10b   :  { %v470_v17 = vadd.f32 %v469_v12, %v3423_v48  ;;  %1248 = vmatprep.mubr.bf16.mxu1 %v893_v7  ;;  %v783_v31 = vmax.f32 %v466_v16, 0.0 }
 0x10c   :  { %v471_v20 = vpop.f32.mrf.mxu0  ;;  %1249 = vmatmul.mubr.bf16.gmra.mxu1 %v892_v8 }
 0x10d   :  { %v472_v22 = vadd.f32 %v471_v20, %v3416_v46  ;;  %v784_v26 = vmax.f32 %v470_v17, 0.0  ;;  %v3572_v20 = vpop.f32.mrf.mxu1 }
 0x10e   :  { %v475_v29 = vpop.f32.mrf.mxu0 }
 0x10f   :  { %v785_v32 = vmax.f32 %v472_v22, 0.0  ;;  %v894_v44 = vpack.c.bf16 %v784_v26, %v782_v35  ;;  %v476_v56 = vadd.f32 %v475_v29, %v3423_v48 }
 0x110   :  { %v477_v37 = vpop.f32.mrf.mxu0 }
 0x111   :  { %v895_v40 = vpack.c.bf16 %v785_v32, %v783_v31  ;;  %v478_v52 = vadd.f32 %v477_v37, %v3416_v46  ;;  %v786_v8 = vmax.f32 %v476_v56, 0.0  ;;  %v2933_v32 = vld [vmem:[%s4027_s5 + $0x40] sm:$0xff]  }
 0x112   :  { %v481_v45 = vpop.f32.mrf.mxu0  ;;  %1850 = vmatpush2.bf16.msra.mxu0 %v2933_v32 }
 0x113   :  { %v482_v55 = vadd.f32 %v481_v45, %v3423_v48  ;;  %1258 = vmatprep.mubr.bf16.mxu1 %v895_v40  ;;  %v787_v36 = vmax.f32 %v478_v52, 0.0  ;;  %v3581_v40 = vpop.f32.mrf.mxu1 }
 0x114   :  { %v483_v57 = vpop.f32.mrf.mxu0  ;;  %1259 = vmatmul.mubr.bf16.gmra.mxu1 %v894_v44 }
 0x115   :  { %v484_v62 = vadd.f32 %v483_v57, %v3416_v46  ;;  %v788_v0 = vmax.f32 %v482_v55, 0.0 }
 0x116   :  { %v487_v2 = vpop.f32.mrf.mxu0 }
 0x117   :  { %v789_v7 = vmax.f32 %v484_v62, 0.0  ;;  %v896_v17 = vpack.c.bf16 %v788_v0, %v786_v8  ;;  %v488_v26 = vadd.f32 %v487_v2, %v3423_v48  ;;  %v3583_v0 = vpop.f32.mrf.mxu1 }
 0x118   :  { %v489_v12 = vpop.f32.mrf.mxu0 }
 0x119   :  { %v897_v16 = vpack.c.bf16 %v789_v7, %v787_v36  ;;  %v490_v22 = vadd.f32 %v489_v12, %v3416_v46  ;;  %v790_v52 = vmax.f32 %v488_v26, 0.0 }
 0x11a   :  { %v493_v18 = vpop.f32.mrf.mxu0 }
 0x11b   :  { %v494_v23 = vadd.f32 %v493_v18, %v3423_v48  ;;  %1268 = vmatprep.mubr.bf16.mxu1 %v897_v16  ;;  %v791_v44 = vmax.f32 %v490_v22, 0.0  ;;  %v3589_v18 = vpop.f32.mrf.mxu1 }
 0x11c   :  { %v495_v29 = vpop.f32.mrf.mxu0  ;;  %1269 = vmatmul.mubr.bf16.gmra.mxu1 %v896_v17 }
 0x11d   :  { %v496_v31 = vadd.f32 %v495_v29, %v3416_v46  ;;  %v792_v35 = vmax.f32 %v494_v23, 0.0 }
 0x11e   :  { %v499_v37 = vpop.f32.mrf.mxu0 }
 0x11f   :  { %v793_v45 = vmax.f32 %v496_v31, 0.0  ;;  %v898_v57 = vpack.c.bf16 %v792_v35, %v790_v52  ;;  %v500_v7 = vadd.f32 %v499_v37, %v3423_v48 }
 0x120   :  { %v501_v55 = vpop.f32.mrf.mxu0 }
 0x121   :  { %v899_v56 = vpack.c.bf16 %v793_v45, %v791_v44  ;;  %v502_v2 = vadd.f32 %v501_v55, %v3416_v46  ;;  %v794_v26 = vmax.f32 %v500_v7, 0.0  ;;  %v3591_v44 = vpop.f32.mrf.mxu1 }
 0x122   :  { %v505_v62 = vpop.f32.mrf.mxu0 }
 0x123   :  { %v506_v36 = vadd.f32 %v505_v62, %v3423_v48  ;;  %1278 = vmatprep.mubr.bf16.mxu1 %v899_v56  ;;  %v795_v22 = vmax.f32 %v502_v2, 0.0  ;;  %v3597_v2 = vpop.f32.mrf.mxu1 }
 0x124   :  { %v507_v8 = vpop.f32.mrf.mxu0  ;;  %1279 = vmatmul.mubr.bf16.gmra.mxu1 %v898_v57 }
 0x125   :  { %v508_v12 = vadd.f32 %v507_v8, %v3416_v46  ;;  %v796_v16 = vmax.f32 %v506_v36, 0.0 }
 0x126   :  { %v511_v17 = vpop.f32.mrf.mxu0 }
 0x127   :  { %v797_v23 = vmax.f32 %v508_v12, 0.0  ;;  %v900_v32 = vpack.c.bf16 %v796_v16, %v794_v26  ;;  %v512_v52 = vadd.f32 %v511_v17, %v3423_v48  ;;  %v3599_v26 = vpop.f32.mrf.mxu1 }
 0x128   :  { %v513_v29 = vpop.f32.mrf.mxu0 }
 0x129   :  { %v901_v31 = vpack.c.bf16 %v797_v23, %v795_v22  ;;  %v514_v45 = vadd.f32 %v513_v29, %v3416_v46  ;;  %v798_v8 = vmax.f32 %v512_v52, 0.0  ;;  %v3605_v52 = vpop.f32.mrf.mxu1 }
 0x12a   :  { %v517_v35 = vpop.f32.mrf.mxu0  ;;  %4033 = vst [vmem:[#allocation2_spill] sm:$0xff] %v3605_v52 }
 0x12b   :  { %v518_v37 = vadd.f32 %v517_v35, %v3423_v48  ;;  %1288 = vmatprep.mubr.bf16.mxu1 %v901_v31  ;;  %v799_v36 = vmax.f32 %v514_v45, 0.0  ;;  %v3607_v43 = vpop.f32.mrf.mxu1 }
 0x12c   :  { %v519_v55 = vpop.f32.mrf.mxu0  ;;  %1289 = vmatmul.mubr.bf16.gmra.mxu1 %v900_v32 }
 0x12d   :  { %v520_v56 = vadd.f32 %v519_v55, %v3416_v46  ;;  %v800_v57 = vmax.f32 %v518_v37, 0.0 }
 0x12e   :  { %v523_v62 = vpop.f32.mrf.mxu0 }
 0x12f   :  { %v801_v7 = vmax.f32 %v520_v56, 0.0  ;;  %v902_v22 = vpack.c.bf16 %v800_v57, %v798_v8  ;;  %v524_v31 = vadd.f32 %v523_v62, %v3423_v48 }
 0x130   :  { %v525_v12 = vpop.f32.mrf.mxu0 }
 0x131   :  { %v903_v16 = vpack.c.bf16 %v801_v7, %v799_v36  ;;  %v526_v29 = vadd.f32 %v525_v12, %v3416_v46  ;;  %v802_v57 = vmax.f32 %v524_v31, 0.0  ;;  %v3613_v31 = vpop.f32.mrf.mxu1 }
 0x132   :  { %v529_v23 = vpop.f32.mrf.mxu0 }
 0x133   :  { %v530_v17 = vadd.f32 %v529_v23, %v3423_v48  ;;  %1298 = vmatprep.mubr.bf16.mxu1 %v903_v16  ;;  %v803_v55 = vmax.f32 %v526_v29, 0.0  ;;  %v3615_v52 = vpop.f32.mrf.mxu1 }
 0x134   :  { %v531_v32 = vpop.f32.mrf.mxu0  ;;  %1299 = vmatmul.mubr.bf16.gmra.mxu1 %v902_v22 }
 0x135   :  { %v532_v35 = vadd.f32 %v531_v32, %v3416_v46  ;;  %v804_v45 = vmax.f32 %v530_v17, 0.0 }
 0x136   :  { %v535_v37 = vpop.f32.mrf.mxu0 }
 0x137   :  { %v805_v56 = vmax.f32 %v532_v35, 0.0  ;;  %v904_v8 = vpack.c.bf16 %v804_v45, %v802_v57  ;;  %v536_v22 = vadd.f32 %v535_v37, %v3423_v48  ;;  %v562_v37 = vadd.f32 %v3430_v53, %v3416_v46 }
 0x138   :  { %v537_v36 = vpop.f32.mrf.mxu0 }
 0x139   :  { %v905_v7 = vpack.c.bf16 %v805_v56, %v803_v55  ;;  %v538_v16 = vadd.f32 %v537_v36, %v3416_v46  ;;  %v806_v55 = vmax.f32 %v536_v22, 0.0 }
 0x13a   :  { %v541_v12 = vpop.f32.mrf.mxu0 }
 0x13b   :  { %v542_v62 = vadd.f32 %v541_v12, %v3423_v48  ;;  %1308 = vmatprep.mubr.bf16.mxu1 %v905_v7  ;;  %v807_v35 = vmax.f32 %v538_v16, 0.0  ;;  %v568_v7 = vadd.f32 %v3442_v63, %v3416_v46 }
 0x13c   :  { %v543_v23 = vpop.f32.mrf.mxu0  ;;  %1309 = vmatmul.mubr.bf16.gmra.mxu1 %v904_v8 }
 0x13d   :  { %v544_v17 = vadd.f32 %v543_v23, %v3416_v46  ;;  %v808_v29 = vmax.f32 %v542_v62, 0.0 }
 0x13e   :  { %v547_v32 = vpop.f32.mrf.mxu0 }
 0x13f   :  { %v809_v45 = vmax.f32 %v544_v17, 0.0  ;;  %v906_v42 = vpack.c.bf16 %v808_v29, %v806_v55  ;;  %v548_v16 = vadd.f32 %v547_v32, %v3423_v48  ;;  %v3625_v17 = vpop.f32.mrf.mxu1  ;;  %v815_v29 = vmax.f32 %v562_v37, 0.0 }
 0x140   :  { %v549_v56 = vpop.f32.mrf.mxu0  ;;  %v580_v37 = vadd.f32 %v3459_v19, %v3416_v46  ;;  %v586_v19 = vadd.f32 %v3464_v28, %v3416_v46 }
 0x141   :  { %v907_v57 = vpack.c.bf16 %v809_v45, %v807_v35  ;;  %v550_v8 = vadd.f32 %v549_v56, %v3416_v46  ;;  %v817_v35 = vmax.f32 %v568_v7, 0.0  ;;  %v810_v55 = vmax.f32 %v548_v16, 0.0 }
 0x142   :  { %v553_v36 = vpop.f32.mrf.mxu0  ;;  %v560_v56 = vadd.f32 %v3425_v50, %v3423_v48 }
 0x143   :  { %v554_v12 = vadd.f32 %v553_v36, %v3423_v48  ;;  %1318 = vmatprep.mubr.bf16.mxu1 %v907_v57  ;;  %v811_v53 = vmax.f32 %v550_v8, 0.0  ;;  %v566_v57 = vadd.f32 %v3436_v58, %v3423_v48  ;;  %v3631_v36 = vpop.f32.mrf.mxu1  ;;  %v911_v7 = vpack.c.bf16 %v817_v35, %v815_v29 }
 0x144   :  { %v555_v62 = vpop.f32.mrf.mxu0  ;;  %1319 = vmatmul.mubr.bf16.gmra.mxu1 %v906_v42  ;;  %v574_v42 = vadd.f32 %v3447_v9, %v3416_v46  ;;  %v814_v8 = vmax.f32 %v560_v56, 0.0  ;;  %v578_v9 = vadd.f32 %v3453_v14, %v3423_v48  ;;  %v592_v29 = vadd.f32 %v3475_v38, %v3416_v46 }
 0x145   :  { %v556_v22 = vadd.f32 %v555_v62, %v3416_v46  ;;  %v812_v23 = vmax.f32 %v554_v12, 0.0  ;;  %v816_v12 = vmax.f32 %v566_v57, 0.0  ;;  %v3637_v16 = vpop.f32.mrf.mxu1  ;;  %v821_v62 = vmax.f32 %v580_v37, 0.0 }
 0x146   :  { %v819_v50 = vmax.f32 %v574_v42, 0.0  ;;  %v584_v14 = vadd.f32 %v3461_v24, %v3423_v48  ;;  %v590_v57 = vadd.f32 %v3469_v33, %v3423_v48  ;;  %v598_v38 = vadd.f32 %v3480_v54, %v3416_v46 }
 0x147   :  { %v813_v45 = vmax.f32 %v556_v22, 0.0  ;;  %v908_v32 = vpack.c.bf16 %v812_v23, %v810_v55  ;;  %v910_v58 = vpack.c.bf16 %v816_v12, %v814_v8  ;;  %v572_v22 = vadd.f32 %v3445_v5, %v3423_v48  ;;  %v3643_v23 = vpop.f32.mrf.mxu1 }
 0x148   :  { %v913_v35 = vpack.c.bf16 %v821_v62, %v819_v50  ;;  %v825_v5 = vmax.f32 %v592_v29, 0.0  ;;  %v822_v37 = vmax.f32 %v584_v14, 0.0  ;;  %v827_v12 = vmax.f32 %v598_v38, 0.0 }
 0x149   :  { %v909_v63 = vpack.c.bf16 %v813_v45, %v811_v53  ;;  %v818_v53 = vmax.f32 %v572_v22, 0.0  ;;  %v820_v45 = vmax.f32 %v578_v9, 0.0  ;;  %v3649_v55 = vpop.f32.mrf.mxu1  ;;  %v596_v33 = vadd.f32 %v3477_v47, %v3423_v48 }
 0x14a   :  { %v602_v62 = vadd.f32 %v3485_v60, %v3423_v48  ;;  %v608_v60 = vadd.f32 %v3493_v10, %v3423_v48 }
 0x14b   :  { %1328 = vmatprep.mubr.bf16.mxu1 %v909_v63  ;;  %v823_v63 = vmax.f32 %v586_v19, 0.0  ;;  %v912_v56 = vpack.c.bf16 %v820_v45, %v818_v53  ;;  %v3655_v28 = vpop.f32.mrf.mxu1  ;;  %v826_v9 = vmax.f32 %v596_v33, 0.0  ;;  %v614_v45 = vadd.f32 %v3501_v21, %v3423_v48 }
 0x14c   :  { %1329 = vmatmul.mubr.bf16.gmra.mxu1 %v908_v32  ;;  %v604_v32 = vadd.f32 %v3491_v3, %v3416_v46  ;;  %v610_v3 = vadd.f32 %v3496_v15, %v3416_v46  ;;  %v828_v19 = vmax.f32 %v602_v62, 0.0  ;;  %v620_v21 = vadd.f32 %v3509_v34, %v3423_v48 }
 0x14d   :  { %1338 = vmatprep.mubr.bf16.mxu1 %v911_v7  ;;  %v915_v42 = vpack.c.bf16 %v825_v5, %v823_v63  ;;  %v824_v7 = vmax.f32 %v590_v57, 0.0  ;;  %v3661_v8 = vpop.f32.mrf.mxu1  ;;  %v628_v63 = vadd.f32 %v3523_v59, %v3416_v46  ;;  %v832_v14 = vmax.f32 %v614_v45, 0.0 }
 0x14e   :  { %v829_v24 = vmax.f32 %v604_v32, 0.0  ;;  %v916_v53 = vpack.c.bf16 %v828_v19, %v826_v9  ;;  %v634_v59 = vadd.f32 %v3528_v11, %v3416_v46  ;;  %v664_v45 = vadd.f32 %v3583_v0, %v3416_v46 }
 0x14f   :  { %v914_v50 = vpack.c.bf16 %v824_v7, %v822_v37  ;;  %v3667_v54 = vpop.f32.mrf.mxu1  ;;  %v837_v10 = vmax.f32 %v628_v63, 0.0  ;;  %v640_v37 = vadd.f32 %v3540_v1, %v3416_v46  ;;  %v646_v1 = vadd.f32 %v3552_v13, %v3416_v46 }
 0x150   :  { %v917_v22 = vpack.c.bf16 %v829_v24, %v827_v12  ;;  %v834_v12 = vmax.f32 %v620_v21, 0.0  ;;  %v839_v33 = vmax.f32 %v634_v59, 0.0  ;;  %v670_v0 = vadd.f32 %v3591_v44, %v3416_v46 }
 0x151   :  { %v3673_v29 = vpop.f32.mrf.mxu1  ;;  %v841_v34 = vmax.f32 %v640_v37, 0.0 }
 0x153   :  { %v3679_v15 = vpop.f32.mrf.mxu1 }
 0x154   :  { %1339 = vmatmul.mubr.bf16.gmra.mxu1 %v910_v58  ;;  %v616_v58 = vadd.f32 %v3507_v27, %v3416_v46  ;;  %v622_v27 = vadd.f32 %v3512_v39, %v3416_v46 }
 0x155   :  { %1348 = vmatprep.mubr.bf16.mxu1 %v913_v35  ;;  %v831_v35 = vmax.f32 %v610_v3, 0.0  ;;  %v3685_v57 = vpop.f32.mrf.mxu1  ;;  %v638_v3 = vadd.f32 %v3537_v25, %v3423_v48  ;;  %v644_v25 = vadd.f32 %v3549_v61, %v3423_v48  ;;  %v849_v61 = vmax.f32 %v664_v45, 0.0 }
 0x156   :  { %v833_v47 = vmax.f32 %v616_v58, 0.0  ;;  %v835_v38 = vmax.f32 %v622_v27, 0.0  ;;  %v652_v58 = vadd.f32 %v3564_v49, %v3416_v46  ;;  %v658_v49 = vadd.f32 %v3572_v20, %v3416_v46 }
 0x157   :  { %v3691_v39 = vpop.f32.mrf.mxu1  ;;  %v840_v19 = vmax.f32 %v638_v3, 0.0  ;;  %v842_v63 = vmax.f32 %v644_v25, 0.0  ;;  %v4036_v25 = vld [vmem:[#allocation2_spill] sm:$0xff] }
 0x158   :  { %v919_v5 = vpack.c.bf16 %v833_v47, %v831_v35  ;;  %v921_v7 = vpack.c.bf16 %v837_v10, %v835_v38  ;;  %v843_v47 = vmax.f32 %v646_v1, 0.0  ;;  %v662_v10 = vadd.f32 %v3581_v40, %v3423_v48 }
 0x159   :  { %v668_v40 = vadd.f32 %v3589_v18, %v3423_v48  ;;  %v4034_v18 = vsub.s32 1, %v3406_v41 }
 0x15a   :  { %v848_v59 = vmax.f32 %v662_v10, 0.0 }
 0x15c   :  { %1349 = vmatmul.mubr.bf16.gmra.mxu1 %v912_v56  ;;  %v830_v56 = vmax.f32 %v608_v60, 0.0  ;;  %v650_v60 = vadd.f32 %v3561_v30, %v3423_v48  ;;  %v656_v30 = vadd.f32 %v3570_v6, %v3423_v48 }
 0x15d   :  { %1358 = vmatprep.mubr.bf16.mxu1 %v915_v42  ;;  %v626_v42 = vadd.f32 %v3517_v51, %v3423_v48  ;;  %v632_v51 = vadd.f32 %v3525_v4, %v3423_v48  ;;  %v845_v4 = vmax.f32 %v652_v58, 0.0  ;;  %v4035_v58 = vsub.s32 0, %v3406_v41 }
 0x15e   :  { %v918_v32 = vpack.c.bf16 %v832_v14, %v830_v56  ;;  %v847_v14 = vmax.f32 %v658_v49, 0.0  ;;  %v686_v49 = vadd.f32 %v3613_v31, %v3423_v48 }
 0x15f   :  { %v836_v24 = vmax.f32 %v626_v42, 0.0  ;;  %v838_v9 = vmax.f32 %v632_v51, 0.0  ;;  %v925_v27 = vpack.c.bf16 %v845_v4, %v843_v47  ;;  %v846_v42 = vmax.f32 %v656_v30, 0.0 }
 0x160   :  { %v927_v21 = vpack.c.bf16 %v849_v61, %v847_v14  ;;  %v856_v31 = vmax.f32 %v686_v49, 0.0 }
 0x161   :  { %v920_v62 = vpack.c.bf16 %v836_v24, %v834_v12  ;;  %v926_v12 = vpack.c.bf16 %v848_v59, %v846_v42  ;;  %v674_v24 = vadd.f32 %v3597_v2, %v3423_v48  ;;  %v850_v2 = vmax.f32 %v668_v40, 0.0 }
 0x163   :  { %v852_v1 = vmax.f32 %v674_v24, 0.0  ;;  %v692_v24 = vadd.f32 %v3625_v17, %v3423_v48 }
 0x164   :  { %1359 = vmatmul.mubr.bf16.gmra.mxu1 %v914_v50  ;;  %v3697_v50 = vpop.f32.mrf.mxu1 }
 0x165   :  { %1368 = vmatprep.mubr.bf16.mxu1 %v917_v22  ;;  %v923_v22 = vpack.c.bf16 %v841_v34, %v839_v33  ;;  %v688_v33 = vadd.f32 %v3615_v52, %v3416_v46  ;;  %v974_v34 = vld [vmem:[%s4029_s4] sm:$0x3] }
 0x166   :  { %v3703_v11 = vpop.f32.mrf.mxu1  ;;  %v3750_v3 = vrot.slane %v974_v34, %v4034_v18 }
 0x168   :  { %v3709_v35 = vpop.f32.mrf.mxu1 }
 0x16a   :  { %v3715_v13 = vpop.f32.mrf.mxu1 }
 0x16c   :  { %1369 = vmatmul.mubr.bf16.gmra.mxu1 %v916_v53  ;;  %v922_v53 = vpack.c.bf16 %v840_v19, %v838_v9  ;;  %v3721_v56 = vpop.f32.mrf.mxu1  ;;  %v857_v9 = vmax.f32 %v688_v33, 0.0 }
 0x16d   :  { %1378 = vmatprep.mubr.bf16.mxu1 %v919_v5  ;;  %v844_v5 = vmax.f32 %v650_v60, 0.0  ;;  %v680_v60 = vadd.f32 %v4036_v25, %v3423_v48 }
 0x16e   :  { %v3727_v20 = vpop.f32.mrf.mxu1 }
 0x16f   :  { %v924_v38 = vpack.c.bf16 %v844_v5, %v842_v63  ;;  %v700_v63 = vadd.f32 %v3643_v23, %v3416_v46 }
 0x170   :  { %v3733_v37 = vpop.f32.mrf.mxu1 }
 0x171   :  { %v861_v59 = vmax.f32 %v700_v63, 0.0 }
 0x172   :  { %v3739_v44 = vpop.f32.mrf.mxu1 }
 0x174   :  { %1379 = vmatmul.mubr.bf16.gmra.mxu1 %v918_v32  ;;  %v676_v32 = vadd.f32 %v3599_v26, %v3416_v46  ;;  %v682_v26 = vadd.f32 %v3607_v43, %v3416_v46  ;;  %v3754_v43 = vrot.slane %v974_v34, %v4035_v58 }
 0x175   :  { %1388 = vmatprep.mubr.bf16.mxu1 %v921_v7  ;;  %v851_v7 = vmax.f32 %v670_v0, 0.0  ;;  %v854_v0 = vmax.f32 %v680_v60, 0.0 }
 0x176   :  { %v853_v6 = vmax.f32 %v676_v32, 0.0  ;;  %v855_v52 = vmax.f32 %v682_v26, 0.0  ;;  %v698_v26 = vadd.f32 %v3637_v16, %v3423_v48  ;;  %v858_v16 = vmax.f32 %v692_v24, 0.0 }
 0x177   :  { %v930_v40 = vpack.c.bf16 %v856_v31, %v854_v0 }
 0x178   :  { %v931_v14 = vpack.c.bf16 %v857_v9, %v855_v52  ;;  %v860_v52 = vmax.f32 %v698_v26, 0.0 }
 0x17a   :  { %v932_v49 = vpack.c.bf16 %v860_v52, %v858_v16 }
 0x17c   :  { %1389 = vmatmul.mubr.bf16.gmra.mxu1 %v920_v62  ;;  %v929_v62 = vpack.c.bf16 %v853_v6, %v851_v7 }
 0x17d   :  { %1398 = vmatprep.mubr.bf16.mxu1 %v923_v22 }
 0x184   :  { %1399 = vmatmul.mubr.bf16.gmra.mxu1 %v922_v53  ;;  %v928_v53 = vpack.c.bf16 %v852_v1, %v850_v2 }
 0x185   :  { %1408 = vmatprep.mubr.bf16.mxu1 %v925_v27  ;;  %v694_v27 = vadd.f32 %v3631_v36, %v3416_v46 }
 0x187   :  { %v859_v42 = vmax.f32 %v694_v27, 0.0 }
 0x189   :  { %v933_v2 = vpack.c.bf16 %v861_v59, %v859_v42 }
 0x18c   :  { %1409 = vmatmul.mubr.bf16.gmra.mxu1 %v924_v38 }
 0x18d   :  { %1418 = vmatprep.mubr.bf16.mxu1 %v927_v21 }
 0x194   :  { %v1180_v51 = vpop.f32.mrf.mxu1  ;;  %1419 = vmatmul.mubr.bf16.gmra.mxu1 %v926_v12 }
 0x195   :  { %1428 = vmatprep.mubr.bf16.mxu1 %v929_v62  ;;  %v1181_v45 = vadd.f32 %v1180_v51, %v3754_v43  ;;  %v706_v62 = vadd.f32 %v3655_v28, %v3416_v46  ;;  %v712_v51 = vadd.f32 %v3667_v54, %v3416_v46 }
 0x196   :  { %v1182_v22 = vpop.f32.mrf.mxu1 }
 0x197   :  { %v1183_v47 = vadd.f32 %v1182_v22, %v3750_v3  ;;  %v1499_v32 = vmax.f32 %v1181_v45, 0.0  ;;  %v704_v45 = vadd.f32 %v3649_v55, %v3423_v48 }
 0x198   :  { %v1184_v19 = vpop.f32.mrf.mxu1 }
 0x199   :  { %v1185_v4 = vadd.f32 %v1184_v19, %v3754_v43  ;;  %v1500_v30 = vmax.f32 %v1183_v47, 0.0  ;;  %v863_v47 = vmax.f32 %v706_v62, 0.0 }
 0x19a   :  { %v1186_v41 = vpop.f32.mrf.mxu1 }
 0x19b   :  { %v1187_v5 = vadd.f32 %v1186_v41, %v3750_v3  ;;  %v1501_v61 = vmax.f32 %v1185_v4, 0.0  ;;  %v865_v4 = vmax.f32 %v712_v51, 0.0  ;;  %v710_v41 = vadd.f32 %v3661_v8, %v3423_v48 }
 0x19c   :  { %v1190_v38 = vpop.f32.mrf.mxu1  ;;  %1429 = vmatmul.mubr.bf16.gmra.mxu1 %v928_v53  ;;  %v862_v8 = vmax.f32 %v704_v45, 0.0 }
 0x19d   :  { %v1502_v10 = vmax.f32 %v1187_v5, 0.0  ;;  %1438 = vmatprep.mubr.bf16.mxu1 %v931_v14  ;;  %v1627_v36 = vpack.c.bf16 %v1501_v61, %v1499_v32  ;;  %v1191_v33 = vadd.f32 %v1190_v38, %v3754_v43  ;;  %v718_v5 = vadd.f32 %v3679_v15, %v3416_v46 }
 0x19e   :  { %v1192_v21 = vpop.f32.mrf.mxu1  ;;  %v724_v14 = vadd.f32 %v3691_v39, %v3416_v46  ;;  %v935_v38 = vpack.c.bf16 %v865_v4, %v863_v47  ;;  %v864_v31 = vmax.f32 %v710_v41, 0.0 }
 0x19f   :  { %v1628_v7 = vpack.c.bf16 %v1502_v10, %v1500_v30  ;;  %v1193_v23 = vadd.f32 %v1192_v21, %v3750_v3  ;;  %v1503_v9 = vmax.f32 %v1191_v33, 0.0  ;;  %v867_v42 = vmax.f32 %v718_v5, 0.0 }
 0x1a0   :  { %v1194_v6 = vpop.f32.mrf.mxu1  ;;  %v869_v59 = vmax.f32 %v724_v14, 0.0  ;;  %v730_v33 = vadd.f32 %v3703_v11, %v3416_v46 }
 0x1a1   :  { %v1195_v12 = vadd.f32 %v1194_v6, %v3754_v43  ;;  %1851 = vmatprep.mubr.bf16.mxu0 %v1628_v7  ;;  %v1504_v17 = vmax.f32 %v1193_v23, 0.0  ;;  %v934_v23 = vpack.c.bf16 %v864_v31, %v862_v8  ;;  %v740_v31 = vadd.f32 %v3721_v56, %v3423_v48 }
 0x1a2   :  { %v1196_v34 = vpop.f32.mrf.mxu1  ;;  %1852 = vmatmul.mubr.bf16.vlgmr.msra.gmra.mxu0 %v1627_v36  ;;  %v937_v51 = vpack.c.bf16 %v869_v59, %v867_v42  ;;  %v871_v16 = vmax.f32 %v730_v33, 0.0 }
 0x1a3   :  { %v1197_v18 = vadd.f32 %v1196_v34, %v3750_v3  ;;  %v1505_v1 = vmax.f32 %v1195_v12, 0.0  ;;  %v716_v12 = vadd.f32 %v3673_v29, %v3423_v48  ;;  %v736_v34 = vadd.f32 %v3715_v13, %v3416_v46 }
 0x1a4   :  { %v1200_v58 = vpop.f32.mrf.mxu1  ;;  %1439 = vmatmul.mubr.bf16.gmra.mxu1 %v930_v40  ;;  %v722_v40 = vadd.f32 %v3685_v57, %v3423_v48 }
 0x1a5   :  { %v1506_v22 = vmax.f32 %v1197_v18, 0.0  ;;  %1448 = vmatprep.mubr.bf16.mxu1 %v933_v2  ;;  %v1629_v28 = vpack.c.bf16 %v1505_v1, %v1503_v9  ;;  %v1201_v27 = vadd.f32 %v1200_v58, %v3754_v43  ;;  %v866_v57 = vmax.f32 %v716_v12, 0.0 }
 0x1a6   :  { %v1202_v19 = vpop.f32.mrf.mxu1  ;;  %v868_v58 = vmax.f32 %v722_v40, 0.0  ;;  %v873_v52 = vmax.f32 %v736_v34, 0.0 }
 0x1a7   :  { %v1630_v53 = vpack.c.bf16 %v1506_v22, %v1504_v17  ;;  %v1203_v54 = vadd.f32 %v1202_v19, %v3750_v3  ;;  %v1507_v32 = vmax.f32 %v1201_v27, 0.0 }
 0x1a8   :  { %v1204_v25 = vpop.f32.mrf.mxu1  ;;  %v936_v4 = vpack.c.bf16 %v868_v58, %v866_v57  ;;  %v939_v41 = vpack.c.bf16 %v873_v52, %v871_v16 }
 0x1a9   :  { %v1205_v60 = vadd.f32 %v1204_v25, %v3754_v43  ;;  %1859 = vmatprep.mubr.bf16.mxu0 %v1630_v53  ;;  %v1508_v55 = vmax.f32 %v1203_v54, 0.0  ;;  %v728_v53 = vadd.f32 %v3697_v50, %v3423_v48 }
 0x1aa   :  { %v1206_v63 = vpop.f32.mrf.mxu1  ;;  %1860 = vmatmul.mubr.bf16.gmra.mxu0 %v1629_v28  ;;  %v734_v28 = vadd.f32 %v3709_v35, %v3423_v48 }
 0x1ab   :  { %v1207_v61 = vadd.f32 %v1206_v63, %v3750_v3  ;;  %v1509_v30 = vmax.f32 %v1205_v60, 0.0  ;;  %v742_v60 = vadd.f32 %v3727_v20, %v3416_v46  ;;  %v870_v35 = vmax.f32 %v728_v53, 0.0 }
 0x1ac   :  { %v1210_v10 = vpop.f32.mrf.mxu1  ;;  %1449 = vmatmul.mubr.bf16.gmra.mxu1 %v932_v49  ;;  %v748_v49 = vadd.f32 %v3739_v44, %v3416_v46  ;;  %v872_v14 = vmax.f32 %v734_v28, 0.0 }
 0x1ad   :  { %v1510_v0 = vmax.f32 %v1207_v61, 0.0  ;;  %1458 = vmatprep.mubr.bf16.mxu1 %v935_v38  ;;  %v1631_v15 = vpack.c.bf16 %v1509_v30, %v1507_v32  ;;  %v1211_v24 = vadd.f32 %v1210_v10, %v3754_v43  ;;  %v875_v30 = vmax.f32 %v742_v60, 0.0 }
 0x1ae   :  { %v1212_v21 = vpop.f32.mrf.mxu1  ;;  %v877_v10 = vmax.f32 %v748_v49, 0.0  ;;  %v938_v8 = vpack.c.bf16 %v872_v14, %v870_v35  ;;  %v746_v32 = vadd.f32 %v3733_v37, %v3423_v48 }
 0x1af   :  { %v1632_v7 = vpack.c.bf16 %v1510_v0, %v1508_v55  ;;  %v1213_v39 = vadd.f32 %v1212_v21, %v3750_v3  ;;  %v1511_v17 = vmax.f32 %v1211_v24, 0.0 }
 0x1b0   :  { %v1214_v36 = vpop.f32.mrf.mxu1  ;;  %v876_v12 = vmax.f32 %v746_v32, 0.0 }
 0x1b1   :  { %v1215_v6 = vadd.f32 %v1214_v36, %v3754_v43  ;;  %1867 = vmatprep.mubr.bf16.mxu0 %v1632_v7  ;;  %v1512_v29 = vmax.f32 %v1213_v39, 0.0  ;;  %v941_v7 = vpack.c.bf16 %v877_v10, %v875_v30 }
 0x1b2   :  { %v1216_v26 = vpop.f32.mrf.mxu1  ;;  %1868 = vmatmul.mubr.bf16.gmra.mxu0 %v1631_v15 }
 0x1b3   :  { %v1217_v62 = vadd.f32 %v1216_v26, %v3750_v3  ;;  %v1513_v18 = vmax.f32 %v1215_v6, 0.0 }
 0x1b4   :  { %v1220_v2 = vpop.f32.mrf.mxu1  ;;  %1459 = vmatmul.mubr.bf16.gmra.mxu1 %v934_v23  ;;  %v874_v23 = vmax.f32 %v740_v31, 0.0 }
 0x1b5   :  { %v1514_v1 = vmax.f32 %v1217_v62, 0.0  ;;  %1468 = vmatprep.mubr.bf16.mxu1 %v937_v51  ;;  %v1633_v11 = vpack.c.bf16 %v1513_v18, %v1511_v17  ;;  %v1221_v25 = vadd.f32 %v1220_v2, %v3754_v43 }
 0x1b6   :  { %v1222_v22 = vpop.f32.mrf.mxu1  ;;  %v940_v34 = vpack.c.bf16 %v876_v12, %v874_v23 }
 0x1b7   :  { %v1634_v9 = vpack.c.bf16 %v1514_v1, %v1512_v29  ;;  %v1223_v13 = vadd.f32 %v1222_v22, %v3750_v3  ;;  %v1515_v61 = vmax.f32 %v1221_v25, 0.0 }
 0x1b8   :  { %v1224_v19 = vpop.f32.mrf.mxu1 }
 0x1b9   :  { %v1225_v47 = vadd.f32 %v1224_v19, %v3754_v43  ;;  %1875 = vmatprep.mubr.bf16.mxu0 %v1634_v9  ;;  %v1516_v50 = vmax.f32 %v1223_v13, 0.0 }
 0x1ba   :  { %v1226_v54 = vpop.f32.mrf.mxu1  ;;  %1876 = vmatmul.mubr.bf16.gmra.mxu0 %v1633_v11 }
 0x1bb   :  { %v1227_v45 = vadd.f32 %v1226_v54, %v3750_v3  ;;  %v1517_v27 = vmax.f32 %v1225_v47, 0.0 }
 0x1bc   :  { %v1230_v63 = vpop.f32.mrf.mxu1  ;;  %1469 = vmatmul.mubr.bf16.gmra.mxu1 %v936_v4 }
 0x1bd   :  { %v1518_v5 = vmax.f32 %v1227_v45, 0.0  ;;  %1478 = vmatprep.mubr.bf16.mxu1 %v939_v41  ;;  %v1635_v20 = vpack.c.bf16 %v1517_v27, %v1515_v61  ;;  %v1231_v21 = vadd.f32 %v1230_v63, %v3754_v43 }
 0x1be   :  { %v1232_v38 = vpop.f32.mrf.mxu1 }
 0x1bf   :  { %v1636_v55 = vpack.c.bf16 %v1518_v5, %v1516_v50  ;;  %v1233_v46 = vadd.f32 %v1232_v38, %v3750_v3  ;;  %v1519_v40 = vmax.f32 %v1231_v21, 0.0 }
 0x1c0   :  { %v1234_v0 = vpop.f32.mrf.mxu1 }
 0x1c1   :  { %v1235_v44 = vadd.f32 %v1234_v0, %v3754_v43  ;;  %1883 = vmatprep.mubr.bf16.mxu0 %v1636_v55  ;;  %v1520_v39 = vmax.f32 %v1233_v46, 0.0 }
 0x1c2   :  { %v1236_v42 = vpop.f32.mrf.mxu1  ;;  %1884 = vmatmul.mubr.bf16.gmra.mxu0 %v1635_v20 }
 0x1c3   :  { %v1237_v59 = vadd.f32 %v1236_v42, %v3750_v3  ;;  %v1521_v15 = vmax.f32 %v1235_v44, 0.0 }
 0x1c4   :  { %v1240_v36 = vpop.f32.mrf.mxu1  ;;  %1479 = vmatmul.mubr.bf16.gmra.mxu1 %v938_v8 }
 0x1c5   :  { %v1522_v6 = vmax.f32 %v1237_v59, 0.0  ;;  %1488 = vmatprep.mubr.bf16.mxu1 %v941_v7  ;;  %v1637_v26 = vpack.c.bf16 %v1521_v15, %v1519_v40  ;;  %v1241_v62 = vadd.f32 %v1240_v36, %v3754_v43 }
 0x1c6   :  { %v1242_v56 = vpop.f32.mrf.mxu1 }
 0x1c7   :  { %v1638_v24 = vpack.c.bf16 %v1522_v6, %v1520_v39  ;;  %v1243_v37 = vadd.f32 %v1242_v56, %v3750_v3  ;;  %v1523_v58 = vmax.f32 %v1241_v62, 0.0 }
 0x1c8   :  { %v1244_v48 = vpop.f32.mrf.mxu1 }
 0x1c9   :  { %v1245_v33 = vadd.f32 %v1244_v48, %v3754_v43  ;;  %1891 = vmatprep.mubr.bf16.mxu0 %v1638_v24  ;;  %v1524_v1 = vmax.f32 %v1243_v37, 0.0 }
 0x1ca   :  { %v1246_v51 = vpop.f32.mrf.mxu1  ;;  %1892 = vmatmul.mubr.bf16.gmra.mxu0 %v1637_v26 }
 0x1cb   :  { %v1247_v18 = vadd.f32 %v1246_v51, %v3750_v3  ;;  %v1525_v2 = vmax.f32 %v1245_v33, 0.0 }
 0x1cc   :  { %v1250_v29 = vpop.f32.mrf.mxu1  ;;  %1489 = vmatmul.mubr.bf16.gmra.mxu1 %v940_v34 }
 0x1cd   :  { %v1526_v57 = vmax.f32 %v1247_v18, 0.0  ;;  %v1639_v16 = vpack.c.bf16 %v1525_v2, %v1523_v58  ;;  %v1251_v19 = vadd.f32 %v1250_v29, %v3754_v43 }
 0x1ce   :  { %v1252_v17 = vpop.f32.mrf.mxu1 }
 0x1cf   :  { %v1640_v22 = vpack.c.bf16 %v1526_v57, %v1524_v1  ;;  %v1253_v9 = vadd.f32 %v1252_v17, %v3750_v3  ;;  %v1527_v54 = vmax.f32 %v1251_v19, 0.0 }
 0x1d0   :  { %v1254_v52 = vpop.f32.mrf.mxu1 }
 0x1d1   :  { %v1255_v11 = vadd.f32 %v1254_v52, %v3754_v43  ;;  %1899 = vmatprep.mubr.bf16.mxu0 %v1640_v22  ;;  %v1528_v28 = vmax.f32 %v1253_v9, 0.0 }
 0x1d2   :  { %v1256_v13 = vpop.f32.mrf.mxu1  ;;  %1900 = vmatmul.mubr.bf16.gmra.mxu0 %v1639_v16 }
 0x1d3   :  { %v1257_v47 = vadd.f32 %v1256_v13, %v3750_v3  ;;  %v1529_v4 = vmax.f32 %v1255_v11, 0.0 }
 0x1d4   :  { %v1260_v53 = vpop.f32.mrf.mxu1 }
 0x1d5   :  { %v1530_v25 = vmax.f32 %v1257_v47, 0.0  ;;  %v1641_v45 = vpack.c.bf16 %v1529_v4, %v1527_v54  ;;  %v1261_v50 = vadd.f32 %v1260_v53, %v3754_v43 }
 0x1d6   :  { %v1262_v60 = vpop.f32.mrf.mxu1 }
 0x1d7   :  { %v1642_v49 = vpack.c.bf16 %v1530_v25, %v1528_v28  ;;  %v1263_v27 = vadd.f32 %v1262_v60, %v3750_v3  ;;  %v1531_v10 = vmax.f32 %v1261_v50, 0.0 }
 0x1d8   :  { %v1264_v41 = vpop.f32.mrf.mxu1 }
 0x1d9   :  { %v1265_v63 = vadd.f32 %v1264_v41, %v3754_v43  ;;  %1907 = vmatprep.mubr.bf16.mxu0 %v1642_v49  ;;  %v1532_v38 = vmax.f32 %v1263_v27, 0.0 }
 0x1da   :  { %v1266_v5 = vpop.f32.mrf.mxu1  ;;  %1908 = vmatmul.mubr.bf16.gmra.mxu0 %v1641_v45 }
 0x1db   :  { %v1267_v35 = vadd.f32 %v1266_v5, %v3750_v3  ;;  %v1533_v14 = vmax.f32 %v1265_v63, 0.0 }
 0x1dc   :  { %v1270_v61 = vpop.f32.mrf.mxu1 }
 0x1dd   :  { %v1534_v30 = vmax.f32 %v1267_v35, 0.0  ;;  %v1643_v0 = vpack.c.bf16 %v1533_v14, %v1531_v10  ;;  %v1271_v31 = vadd.f32 %v1270_v61, %v3754_v43 }
 0x1de   :  { %v1272_v55 = vpop.f32.mrf.mxu1 }
 0x1df   :  { %v1644_v20 = vpack.c.bf16 %v1534_v30, %v1532_v38  ;;  %v1273_v44 = vadd.f32 %v1272_v55, %v3750_v3  ;;  %v1535_v36 = vmax.f32 %v1271_v31, 0.0 }
 0x1e0   :  { %v1274_v46 = vpop.f32.mrf.mxu1 }
 0x1e1   :  { %v1275_v8 = vadd.f32 %v1274_v46, %v3754_v43  ;;  %1915 = vmatprep.mubr.bf16.mxu0 %v1644_v20  ;;  %v1536_v7 = vmax.f32 %v1273_v44, 0.0 }
 0x1e2   :  { %v1276_v32 = vpop.f32.mrf.mxu1  ;;  %1916 = vmatmul.mubr.bf16.gmra.mxu0 %v1643_v0 }
 0x1e3   :  { %v1277_v21 = vadd.f32 %v1276_v32, %v3750_v3  ;;  %v1537_v42 = vmax.f32 %v1275_v8, 0.0 }
 0x1e4   :  { %v1280_v59 = vpop.f32.mrf.mxu1 }
 0x1e5   :  { %v1538_v15 = vmax.f32 %v1277_v21, 0.0  ;;  %v1645_v23 = vpack.c.bf16 %v1537_v42, %v1535_v36  ;;  %v1281_v24 = vadd.f32 %v1280_v59, %v3754_v43 }
 0x1e6   :  { %v1282_v39 = vpop.f32.mrf.mxu1 }
 0x1e7   :  { %v1646_v6 = vpack.c.bf16 %v1538_v15, %v1536_v7  ;;  %v1283_v40 = vadd.f32 %v1282_v39, %v3750_v3  ;;  %v1539_v51 = vmax.f32 %v1281_v24, 0.0 }
 0x1e8   :  { %v1284_v12 = vpop.f32.mrf.mxu1 }
 0x1e9   :  { %v1285_v56 = vadd.f32 %v1284_v12, %v3754_v43  ;;  %1923 = vmatprep.mubr.bf16.mxu0 %v1646_v6  ;;  %v1540_v34 = vmax.f32 %v1283_v40, 0.0 }
 0x1ea   :  { %v1286_v26 = vpop.f32.mrf.mxu1  ;;  %1924 = vmatmul.mubr.bf16.gmra.mxu0 %v1645_v23 }
 0x1eb   :  { %v1287_v48 = vadd.f32 %v1286_v26, %v3750_v3  ;;  %v1541_v37 = vmax.f32 %v1285_v56, 0.0 }
 0x1ec   :  { %v1290_v33 = vpop.f32.mrf.mxu1 }
 0x1ed   :  { %v1542_v62 = vmax.f32 %v1287_v48, 0.0  ;;  %v1647_v29 = vpack.c.bf16 %v1541_v37, %v1539_v51  ;;  %v1291_v17 = vadd.f32 %v1290_v33, %v3754_v43 }
 0x1ee   :  { %v1292_v18 = vpop.f32.mrf.mxu1 }
 0x1ef   :  { %v1648_v2 = vpack.c.bf16 %v1542_v62, %v1540_v34  ;;  %v1293_v57 = vadd.f32 %v1292_v18, %v3750_v3  ;;  %v1543_v13 = vmax.f32 %v1291_v17, 0.0 }
 0x1f0   :  { %v1294_v1 = vpop.f32.mrf.mxu1 }
 0x1f1   :  { %v1295_v58 = vadd.f32 %v1294_v1, %v3754_v43  ;;  %1931 = vmatprep.mubr.bf16.mxu0 %v1648_v2  ;;  %v1544_v11 = vmax.f32 %v1293_v57, 0.0 }
 0x1f2   :  { %v1296_v22 = vpop.f32.mrf.mxu1  ;;  %1932 = vmatmul.mubr.bf16.gmra.mxu0 %v1647_v29 }
 0x1f3   :  { %v1297_v16 = vadd.f32 %v1296_v22, %v3750_v3  ;;  %v1545_v52 = vmax.f32 %v1295_v58, 0.0 }
 0x1f4   :  { %v1300_v9 = vpop.f32.mrf.mxu1 }
 0x1f5   :  { %v1546_v19 = vmax.f32 %v1297_v16, 0.0  ;;  %v1649_v53 = vpack.c.bf16 %v1545_v52, %v1543_v13  ;;  %v1301_v60 = vadd.f32 %v1300_v9, %v3754_v43 }
 0x1f6   :  { %v1302_v47 = vpop.f32.mrf.mxu1 }
 0x1f7   :  { %v1650_v4 = vpack.c.bf16 %v1546_v19, %v1544_v11  ;;  %v1303_v25 = vadd.f32 %v1302_v47, %v3750_v3  ;;  %v1547_v5 = vmax.f32 %v1301_v60, 0.0 }
 0x1f8   :  { %v1304_v28 = vpop.f32.mrf.mxu1 }
 0x1f9   :  { %v1305_v54 = vadd.f32 %v1304_v28, %v3754_v43  ;;  %1939 = vmatprep.mubr.bf16.mxu0 %v1650_v4  ;;  %v1548_v63 = vmax.f32 %v1303_v25, 0.0 }
 0x1fa   :  { %v1306_v49 = vpop.f32.mrf.mxu1  ;;  %1940 = vmatmul.mubr.bf16.gmra.mxu0 %v1649_v53 }
 0x1fb   :  { %v1307_v45 = vadd.f32 %v1306_v49, %v3750_v3  ;;  %v1549_v41 = vmax.f32 %v1305_v54, 0.0 }
 0x1fc   :  { %v1310_v27 = vpop.f32.mrf.mxu1 }
 0x1fd   :  { %v1550_v50 = vmax.f32 %v1307_v45, 0.0  ;;  %v1651_v61 = vpack.c.bf16 %v1549_v41, %v1547_v5  ;;  %v1311_v55 = vadd.f32 %v1310_v27, %v3754_v43 }
 0x1fe   :  { %v1312_v35 = vpop.f32.mrf.mxu1 }
 0x1ff   :  { %v1652_v14 = vpack.c.bf16 %v1550_v50, %v1548_v63  ;;  %v1313_v30 = vadd.f32 %v1312_v35, %v3750_v3  ;;  %v1551_v32 = vmax.f32 %v1311_v55, 0.0 }
 0x200   :  { %v1314_v38 = vpop.f32.mrf.mxu1 }
 0x201   :  { %v1315_v10 = vadd.f32 %v1314_v38, %v3754_v43  ;;  %1947 = vmatprep.mubr.bf16.mxu0 %v1652_v14  ;;  %v1552_v8 = vmax.f32 %v1313_v30, 0.0 }
 0x202   :  { %v1316_v20 = vpop.f32.mrf.mxu1  ;;  %1948 = vmatmul.mubr.bf16.gmra.mxu0 %v1651_v61 }
 0x203   :  { %v1317_v0 = vadd.f32 %v1316_v20, %v3750_v3  ;;  %v1553_v46 = vmax.f32 %v1315_v10, 0.0 }
 0x204   :  { %v1320_v44 = vpop.f32.mrf.mxu1 }
 0x205   :  { %v1554_v31 = vmax.f32 %v1317_v0, 0.0  ;;  %v1653_v59 = vpack.c.bf16 %v1553_v46, %v1551_v32  ;;  %v1321_v39 = vadd.f32 %v1320_v44, %v3754_v43 }
 0x206   :  { %v1322_v21 = vpop.f32.mrf.mxu1 }
 0x207   :  { %v1654_v42 = vpack.c.bf16 %v1554_v31, %v1552_v8  ;;  %v1323_v15 = vadd.f32 %v1322_v21, %v3750_v3  ;;  %v1555_v26 = vmax.f32 %v1321_v39, 0.0 }
 0x208   :  { %v1324_v7 = vpop.f32.mrf.mxu1 }
 0x209   :  { %v1325_v36 = vadd.f32 %v1324_v7, %v3754_v43  ;;  %1955 = vmatprep.mubr.bf16.mxu0 %v1654_v42  ;;  %v1556_v56 = vmax.f32 %v1323_v15, 0.0 }
 0x20a   :  { %v1326_v6 = vpop.f32.mrf.mxu1  ;;  %1956 = vmatmul.mubr.bf16.gmra.mxu0 %v1653_v59 }
 0x20b   :  { %v1327_v23 = vadd.f32 %v1326_v6, %v3750_v3  ;;  %v1557_v12 = vmax.f32 %v1325_v36, 0.0 }
 0x20c   :  { %v1330_v40 = vpop.f32.mrf.mxu1 }
 0x20d   :  { %v1558_v24 = vmax.f32 %v1327_v23, 0.0  ;;  %v1655_v33 = vpack.c.bf16 %v1557_v12, %v1555_v26  ;;  %v1331_v18 = vadd.f32 %v1330_v40, %v3754_v43 }
 0x20e   :  { %v1332_v48 = vpop.f32.mrf.mxu1 }
 0x20f   :  { %v1656_v37 = vpack.c.bf16 %v1558_v24, %v1556_v56  ;;  %v1333_v62 = vadd.f32 %v1332_v48, %v3750_v3  ;;  %v1559_v22 = vmax.f32 %v1331_v18, 0.0 }
 0x210   :  { %v1334_v34 = vpop.f32.mrf.mxu1 }
 0x211   :  { %v1335_v51 = vadd.f32 %v1334_v34, %v3754_v43  ;;  %1963 = vmatprep.mubr.bf16.mxu0 %v1656_v37  ;;  %v1560_v58 = vmax.f32 %v1333_v62, 0.0 }
 0x212   :  { %v1336_v2 = vpop.f32.mrf.mxu1  ;;  %1964 = vmatmul.mubr.bf16.gmra.mxu0 %v1655_v33 }
 0x213   :  { %v1337_v29 = vadd.f32 %v1336_v2, %v3750_v3  ;;  %v1561_v1 = vmax.f32 %v1335_v51, 0.0 }
 0x214   :  { %v1340_v57 = vpop.f32.mrf.mxu1 }
 0x215   :  { %v1562_v17 = vmax.f32 %v1337_v29, 0.0  ;;  %v1657_v9 = vpack.c.bf16 %v1561_v1, %v1559_v22  ;;  %v1341_v47 = vadd.f32 %v1340_v57, %v3754_v43 }
 0x216   :  { %v1342_v16 = vpop.f32.mrf.mxu1 }
 0x217   :  { %v1658_v52 = vpack.c.bf16 %v1562_v17, %v1560_v58  ;;  %v1343_v19 = vadd.f32 %v1342_v16, %v3750_v3  ;;  %v1563_v49 = vmax.f32 %v1341_v47, 0.0 }
 0x218   :  { %v1344_v11 = vpop.f32.mrf.mxu1 }
 0x219   :  { %v1345_v13 = vadd.f32 %v1344_v11, %v3754_v43  ;;  %1971 = vmatprep.mubr.bf16.mxu0 %v1658_v52  ;;  %v1564_v54 = vmax.f32 %v1343_v19, 0.0 }
 0x21a   :  { %v1346_v4 = vpop.f32.mrf.mxu1  ;;  %1972 = vmatmul.mubr.bf16.gmra.mxu0 %v1657_v9 }
 0x21b   :  { %v1347_v53 = vadd.f32 %v1346_v4, %v3750_v3  ;;  %v1565_v28 = vmax.f32 %v1345_v13, 0.0 }
 0x21c   :  { %v1350_v25 = vpop.f32.mrf.mxu1 }
 0x21d   :  { %v1566_v60 = vmax.f32 %v1347_v53, 0.0  ;;  %v1659_v27 = vpack.c.bf16 %v1565_v28, %v1563_v49  ;;  %v1351_v35 = vadd.f32 %v1350_v25, %v3754_v43 }
 0x21e   :  { %v1352_v45 = vpop.f32.mrf.mxu1 }
 0x21f   :  { %v1660_v41 = vpack.c.bf16 %v1566_v60, %v1564_v54  ;;  %v1353_v50 = vadd.f32 %v1352_v45, %v3750_v3  ;;  %v1567_v20 = vmax.f32 %v1351_v35, 0.0 }
 0x220   :  { %v1354_v63 = vpop.f32.mrf.mxu1 }
 0x221   :  { %v1355_v5 = vadd.f32 %v1354_v63, %v3754_v43  ;;  %1979 = vmatprep.mubr.bf16.mxu0 %v1660_v41  ;;  %v1568_v10 = vmax.f32 %v1353_v50, 0.0 }
 0x222   :  { %v1356_v14 = vpop.f32.mrf.mxu1  ;;  %1980 = vmatmul.mubr.bf16.gmra.mxu0 %v1659_v27 }
 0x223   :  { %v1357_v61 = vadd.f32 %v1356_v14, %v3750_v3  ;;  %v1569_v38 = vmax.f32 %v1355_v5, 0.0 }
 0x224   :  { %v1360_v30 = vpop.f32.mrf.mxu1 }
 0x225   :  { %v1570_v55 = vmax.f32 %v1357_v61, 0.0  ;;  %v1661_v44 = vpack.c.bf16 %v1569_v38, %v1567_v20  ;;  %v1361_v21 = vadd.f32 %v1360_v30, %v3754_v43 }
 0x226   :  { %v1362_v0 = vpop.f32.mrf.mxu1 }
 0x227   :  { %v1662_v46 = vpack.c.bf16 %v1570_v55, %v1568_v10  ;;  %v1363_v31 = vadd.f32 %v1362_v0, %v3750_v3  ;;  %v1571_v6 = vmax.f32 %v1361_v21, 0.0 }
 0x228   :  { %v1364_v8 = vpop.f32.mrf.mxu1 }
 0x229   :  { %v1365_v32 = vadd.f32 %v1364_v8, %v3754_v43  ;;  %1987 = vmatprep.mubr.bf16.mxu0 %v1662_v46  ;;  %v1572_v36 = vmax.f32 %v1363_v31, 0.0 }
 0x22a   :  { %v1366_v42 = vpop.f32.mrf.mxu1  ;;  %1988 = vmatmul.mubr.bf16.gmra.mxu0 %v1661_v44 }
 0x22b   :  { %v1367_v59 = vadd.f32 %v1366_v42, %v3750_v3  ;;  %v1573_v7 = vmax.f32 %v1365_v32, 0.0 }
 0x22c   :  { %v1370_v15 = vpop.f32.mrf.mxu1 }
 0x22d   :  { %v1574_v39 = vmax.f32 %v1367_v59, 0.0  ;;  %v1663_v40 = vpack.c.bf16 %v1573_v7, %v1571_v6  ;;  %v1371_v48 = vadd.f32 %v1370_v15, %v3754_v43 }
 0x22e   :  { %v1372_v23 = vpop.f32.mrf.mxu1 }
 0x22f   :  { %v1664_v12 = vpack.c.bf16 %v1574_v39, %v1572_v36  ;;  %v1373_v24 = vadd.f32 %v1372_v23, %v3750_v3  ;;  %v1575_v2 = vmax.f32 %v1371_v48, 0.0 }
 0x230   :  { %v1374_v56 = vpop.f32.mrf.mxu1 }
 0x231   :  { %v1375_v26 = vadd.f32 %v1374_v56, %v3754_v43  ;;  %1995 = vmatprep.mubr.bf16.mxu0 %v1664_v12  ;;  %v1576_v51 = vmax.f32 %v1373_v24, 0.0 }
 0x232   :  { %v1376_v37 = vpop.f32.mrf.mxu1  ;;  %1996 = vmatmul.mubr.bf16.gmra.mxu0 %v1663_v40 }
 0x233   :  { %v1377_v33 = vadd.f32 %v1376_v37, %v3750_v3  ;;  %v1577_v34 = vmax.f32 %v1375_v26, 0.0 }
 0x234   :  { %v1380_v62 = vpop.f32.mrf.mxu1 }
 0x235   :  { %v1578_v18 = vmax.f32 %v1377_v33, 0.0  ;;  %v1665_v57 = vpack.c.bf16 %v1577_v34, %v1575_v2  ;;  %v1381_v16 = vadd.f32 %v1380_v62, %v3754_v43 }
 0x236   :  { %v1382_v29 = vpop.f32.mrf.mxu1 }
 0x237   :  { %v1666_v1 = vpack.c.bf16 %v1578_v18, %v1576_v51  ;;  %v1383_v17 = vadd.f32 %v1382_v29, %v3750_v3  ;;  %v1579_v4 = vmax.f32 %v1381_v16, 0.0 }
 0x238   :  { %v1384_v58 = vpop.f32.mrf.mxu1 }
 0x239   :  { %v1385_v22 = vadd.f32 %v1384_v58, %v3754_v43  ;;  %2003 = vmatprep.mubr.bf16.mxu0 %v1666_v1  ;;  %v1580_v13 = vmax.f32 %v1383_v17, 0.0 }
 0x23a   :  { %v1386_v52 = vpop.f32.mrf.mxu1  ;;  %2004 = vmatmul.mubr.bf16.gmra.mxu0 %v1665_v57 }
 0x23b   :  { %v1387_v9 = vadd.f32 %v1386_v52, %v3750_v3  ;;  %v1581_v11 = vmax.f32 %v1385_v22, 0.0 }
 0x23c   :  { %v1390_v19 = vpop.f32.mrf.mxu1 }
 0x23d   :  { %v1582_v47 = vmax.f32 %v1387_v9, 0.0  ;;  %v1667_v25 = vpack.c.bf16 %v1581_v11, %v1579_v4  ;;  %v1391_v45 = vadd.f32 %v1390_v19, %v3754_v43 }
 0x23e   :  { %v1392_v53 = vpop.f32.mrf.mxu1 }
 0x23f   :  { %v1668_v28 = vpack.c.bf16 %v1582_v47, %v1580_v13  ;;  %v1393_v60 = vadd.f32 %v1392_v53, %v3750_v3  ;;  %v1583_v14 = vmax.f32 %v1391_v45, 0.0 }
 0x240   :  { %v1394_v54 = vpop.f32.mrf.mxu1 }
 0x241   :  { %v1395_v49 = vadd.f32 %v1394_v54, %v3754_v43  ;;  %2011 = vmatprep.mubr.bf16.mxu0 %v1668_v28  ;;  %v1584_v5 = vmax.f32 %v1393_v60, 0.0 }
 0x242   :  { %v1396_v41 = vpop.f32.mrf.mxu1  ;;  %2012 = vmatmul.mubr.bf16.gmra.mxu0 %v1667_v25 }
 0x243   :  { %v1397_v27 = vadd.f32 %v1396_v41, %v3750_v3  ;;  %v1585_v63 = vmax.f32 %v1395_v49, 0.0 }
 0x244   :  { %v1400_v50 = vpop.f32.mrf.mxu1 }
 0x245   :  { %v1586_v35 = vmax.f32 %v1397_v27, 0.0  ;;  %v1669_v30 = vpack.c.bf16 %v1585_v63, %v1583_v14  ;;  %v1401_v0 = vadd.f32 %v1400_v50, %v3754_v43 }
 0x246   :  { %v1402_v61 = vpop.f32.mrf.mxu1 }
 0x247   :  { %v1670_v38 = vpack.c.bf16 %v1586_v35, %v1584_v5  ;;  %v1403_v55 = vadd.f32 %v1402_v61, %v3750_v3  ;;  %v1587_v42 = vmax.f32 %v1401_v0, 0.0 }
 0x248   :  { %v1404_v10 = vpop.f32.mrf.mxu1 }
 0x249   :  { %v1405_v20 = vadd.f32 %v1404_v10, %v3754_v43  ;;  %2019 = vmatprep.mubr.bf16.mxu0 %v1670_v38  ;;  %v1588_v32 = vmax.f32 %v1403_v55, 0.0 }
 0x24a   :  { %v1406_v46 = vpop.f32.mrf.mxu1  ;;  %2020 = vmatmul.mubr.bf16.gmra.mxu0 %v1669_v30 }
 0x24b   :  { %v1407_v44 = vadd.f32 %v1406_v46, %v3750_v3  ;;  %v1589_v8 = vmax.f32 %v1405_v20, 0.0 }
 0x24c   :  { %v1410_v31 = vpop.f32.mrf.mxu1 }
 0x24d   :  { %v1590_v21 = vmax.f32 %v1407_v44, 0.0  ;;  %v1671_v15 = vpack.c.bf16 %v1589_v8, %v1587_v42  ;;  %v1411_v23 = vadd.f32 %v1410_v31, %v3754_v43 }
 0x24e   :  { %v1412_v59 = vpop.f32.mrf.mxu1 }
 0x24f   :  { %v1672_v7 = vpack.c.bf16 %v1590_v21, %v1588_v32  ;;  %v1413_v39 = vadd.f32 %v1412_v59, %v3750_v3  ;;  %v1591_v37 = vmax.f32 %v1411_v23, 0.0 }
 0x250   :  { %v1414_v36 = vpop.f32.mrf.mxu1 }
 0x251   :  { %v1415_v6 = vadd.f32 %v1414_v36, %v3754_v43  ;;  %2027 = vmatprep.mubr.bf16.mxu0 %v1672_v7  ;;  %v1592_v26 = vmax.f32 %v1413_v39, 0.0 }
 0x252   :  { %v1416_v12 = vpop.f32.mrf.mxu1  ;;  %2028 = vmatmul.mubr.bf16.gmra.mxu0 %v1671_v15 }
 0x253   :  { %v1417_v40 = vadd.f32 %v1416_v12, %v3750_v3  ;;  %v1593_v56 = vmax.f32 %v1415_v6, 0.0 }
 0x254   :  { %v1420_v24 = vpop.f32.mrf.mxu1 }
 0x255   :  { %v1594_v48 = vmax.f32 %v1417_v40, 0.0  ;;  %v1673_v62 = vpack.c.bf16 %v1593_v56, %v1591_v37  ;;  %v1421_v29 = vadd.f32 %v1420_v24, %v3754_v43 }
 0x256   :  { %v1422_v33 = vpop.f32.mrf.mxu1 }
 0x257   :  { %v1674_v34 = vpack.c.bf16 %v1594_v48, %v1592_v26  ;;  %v1423_v18 = vadd.f32 %v1422_v33, %v3750_v3  ;;  %v1595_v52 = vmax.f32 %v1421_v29, 0.0 }
 0x258   :  { %v1424_v51 = vpop.f32.mrf.mxu1 }
 0x259   :  { %v1425_v2 = vadd.f32 %v1424_v51, %v3754_v43  ;;  %2035 = vmatprep.mubr.bf16.mxu0 %v1674_v34  ;;  %v1596_v22 = vmax.f32 %v1423_v18, 0.0 }
 0x25a   :  { %v1426_v1 = vpop.f32.mrf.mxu1  ;;  %2036 = vmatmul.mubr.bf16.gmra.mxu0 %v1673_v62 }
 0x25b   :  { %v1427_v57 = vadd.f32 %v1426_v1, %v3750_v3  ;;  %v1597_v58 = vmax.f32 %v1425_v2, 0.0 }
 0x25c   :  { %v1430_v17 = vpop.f32.mrf.mxu1 }
 0x25d   :  { %v1598_v16 = vmax.f32 %v1427_v57, 0.0  ;;  %v1675_v19 = vpack.c.bf16 %v1597_v58, %v1595_v52  ;;  %v1431_v53 = vadd.f32 %v1430_v17, %v3754_v43 }
 0x25e   :  { %v1432_v9 = vpop.f32.mrf.mxu1 }
 0x25f   :  { %v1676_v11 = vpack.c.bf16 %v1598_v16, %v1596_v22  ;;  %v1433_v47 = vadd.f32 %v1432_v9, %v3750_v3  ;;  %v1599_v63 = vmax.f32 %v1431_v53, 0.0 }
 0x260   :  { %v1434_v13 = vpop.f32.mrf.mxu1 }
 0x261   :  { %v1435_v4 = vadd.f32 %v1434_v13, %v3754_v43  ;;  %2043 = vmatprep.mubr.bf16.mxu0 %v1676_v11  ;;  %v1600_v41 = vmax.f32 %v1433_v47, 0.0 }
 0x262   :  { %v1436_v28 = vpop.f32.mrf.mxu1  ;;  %v1853_v25 = vpop.f32.mrf.mxu0  ;;  %2044 = vmatmul.mubr.bf16.gmra.mxu0 %v1675_v19 }
 0x263   :  { %v1437_v54 = vadd.f32 %v1436_v28, %v3750_v3  ;;  %v1601_v60 = vmax.f32 %v1435_v4, 0.0 }
 0x264   :  { %v1440_v49 = vpop.f32.mrf.mxu1  ;;  %v1855_v45 = vpop.f32.mrf.mxu0 }
 0x265   :  { %v1602_v27 = vmax.f32 %v1437_v54, 0.0  ;;  %v1677_v61 = vpack.c.bf16 %v1601_v60, %v1599_v63  ;;  %v1441_v20 = vadd.f32 %v1440_v49, %v3754_v43 }
 0x266   :  { %v1442_v50 = vpop.f32.mrf.mxu1  ;;  %v1856_v5 = vpop.f32.mrf.mxu0 }
 0x267   :  { %v1678_v35 = vpack.c.bf16 %v1602_v27, %v1600_v41  ;;  %v2677_v14 = vpack.c.bf16 %v1856_v5, %v1853_v25  ;;  %v1443_v10 = vadd.f32 %v1442_v50, %v3750_v3  ;;  %v1603_v59 = vmax.f32 %v1441_v20, 0.0 }
 0x268   :  { %v1444_v38 = vpop.f32.mrf.mxu1  ;;  %v1858_v30 = vpop.f32.mrf.mxu0 }
 0x269   :  { %2678 = vst [vmem:[%s4030_s6] sm:$0xff] %v2677_v14   ;;  %v1445_v55 = vadd.f32 %v1444_v38, %v3754_v43  ;;  %2051 = vmatprep.mubr.bf16.mxu0 %v1678_v35  ;;  %v1604_v21 = vmax.f32 %v1443_v10, 0.0 }
 0x26a   :  { %v1446_v0 = vpop.f32.mrf.mxu1  ;;  %v1861_v46 = vpop.f32.mrf.mxu0  ;;  %2052 = vmatmul.mubr.bf16.gmra.mxu0 %v1677_v61 }
 0x26b   :  { %v1447_v44 = vadd.f32 %v1446_v0, %v3750_v3  ;;  %v1605_v8 = vmax.f32 %v1445_v55, 0.0 }
 0x26c   :  { %v1450_v31 = vpop.f32.mrf.mxu1  ;;  %v1863_v32 = vpop.f32.mrf.mxu0 }
 0x26d   :  { %v1606_v42 = vmax.f32 %v1447_v44, 0.0  ;;  %v1679_v6 = vpack.c.bf16 %v1605_v8, %v1603_v59  ;;  %v1451_v24 = vadd.f32 %v1450_v31, %v3754_v43 }
 0x26e   :  { %v1452_v7 = vpop.f32.mrf.mxu1  ;;  %v1864_v15 = vpop.f32.mrf.mxu0 }
 0x26f   :  { %v1680_v36 = vpack.c.bf16 %v1606_v42, %v1604_v21  ;;  %v2682_v39 = vpack.c.bf16 %v1864_v15, %v1861_v46  ;;  %v1453_v40 = vadd.f32 %v1452_v7, %v3750_v3  ;;  %v1607_v2 = vmax.f32 %v1451_v24, 0.0 }
 0x270   :  { %v1454_v23 = vpop.f32.mrf.mxu1  ;;  %v1866_v12 = vpop.f32.mrf.mxu0 }
 0x271   :  { %2834 = vst [vmem:[%s4030_s6 + $0x8] sm:$0xff] %v2682_v39   ;;  %v1455_v56 = vadd.f32 %v1454_v23, %v3754_v43  ;;  %2059 = vmatprep.mubr.bf16.mxu0 %v1680_v36  ;;  %v1608_v51 = vmax.f32 %v1453_v40, 0.0 }
 0x272   :  { %v1456_v26 = vpop.f32.mrf.mxu1  ;;  %v1869_v48 = vpop.f32.mrf.mxu0  ;;  %2060 = vmatmul.mubr.bf16.gmra.mxu0 %v1679_v6 }
 0x273   :  { %v1457_v37 = vadd.f32 %v1456_v26, %v3750_v3  ;;  %v1609_v33 = vmax.f32 %v1455_v56, 0.0 }
 0x274   :  { %v1460_v34 = vpop.f32.mrf.mxu1  ;;  %v1871_v62 = vpop.f32.mrf.mxu0 }
 0x275   :  { %v1610_v18 = vmax.f32 %v1457_v37, 0.0  ;;  %v1681_v17 = vpack.c.bf16 %v1609_v33, %v1607_v2  ;;  %v1461_v11 = vadd.f32 %v1460_v34, %v3754_v43 }
 0x276   :  { %v1462_v29 = vpop.f32.mrf.mxu1  ;;  %v1872_v1 = vpop.f32.mrf.mxu0 }
 0x277   :  { %v1682_v57 = vpack.c.bf16 %v1610_v18, %v1608_v51  ;;  %v2687_v58 = vpack.c.bf16 %v1872_v1, %v1869_v48  ;;  %v1463_v52 = vadd.f32 %v1462_v29, %v3750_v3  ;;  %v1611_v60 = vmax.f32 %v1461_v11, 0.0 }
 0x278   :  { %v1464_v22 = vpop.f32.mrf.mxu1  ;;  %v1874_v16 = vpop.f32.mrf.mxu0 }
 0x279   :  { %2835 = vst [vmem:[%s4030_s6 + $0x10] sm:$0xff] %v2687_v58   ;;  %v1465_v9 = vadd.f32 %v1464_v22, %v3754_v43  ;;  %2067 = vmatprep.mubr.bf16.mxu0 %v1682_v57  ;;  %v1612_v25 = vmax.f32 %v1463_v52, 0.0 }
 0x27a   :  { %v1466_v19 = vpop.f32.mrf.mxu1  ;;  %v1877_v13 = vpop.f32.mrf.mxu0  ;;  %2068 = vmatmul.mubr.bf16.gmra.mxu0 %v1681_v17 }
 0x27b   :  { %v1467_v47 = vadd.f32 %v1466_v19, %v3750_v3  ;;  %v1613_v4 = vmax.f32 %v1465_v9, 0.0 }
 0x27c   :  { %v1470_v53 = vpop.f32.mrf.mxu1  ;;  %v1879_v28 = vpop.f32.mrf.mxu0 }
 0x27d   :  { %v1614_v54 = vmax.f32 %v1467_v47, 0.0  ;;  %v1683_v63 = vpack.c.bf16 %v1613_v4, %v1611_v60  ;;  %v1471_v61 = vadd.f32 %v1470_v53, %v3754_v43 }
 0x27e   :  { %v1472_v49 = vpop.f32.mrf.mxu1  ;;  %v1880_v45 = vpop.f32.mrf.mxu0 }
 0x27f   :  { %v1684_v41 = vpack.c.bf16 %v1614_v54, %v1612_v25  ;;  %v2692_v27 = vpack.c.bf16 %v1880_v45, %v1877_v13  ;;  %v1473_v35 = vadd.f32 %v1472_v49, %v3750_v3  ;;  %v1615_v8 = vmax.f32 %v1471_v61, 0.0 }
 0x280   :  { %v1474_v50 = vpop.f32.mrf.mxu1  ;;  %v1882_v5 = vpop.f32.mrf.mxu0 }
 0x281   :  { %2836 = vst [vmem:[%s4030_s6 + $0x18] sm:$0xff] %v2692_v27   ;;  %v1475_v14 = vadd.f32 %v1474_v50, %v3754_v43  ;;  %2075 = vmatprep.mubr.bf16.mxu0 %v1684_v41  ;;  %v1616_v46 = vmax.f32 %v1473_v35, 0.0 }
 0x282   :  { %v1476_v38 = vpop.f32.mrf.mxu1  ;;  %v1885_v30 = vpop.f32.mrf.mxu0  ;;  %2076 = vmatmul.mubr.bf16.gmra.mxu0 %v1683_v63 }
 0x283   :  { %v1477_v10 = vadd.f32 %v1476_v38, %v3750_v3  ;;  %v1617_v55 = vmax.f32 %v1475_v14, 0.0 }
 0x284   :  { %v1480_v20 = vpop.f32.mrf.mxu1  ;;  %v1887_v0 = vpop.f32.mrf.mxu0 }
 0x285   :  { %v1618_v44 = vmax.f32 %v1477_v10, 0.0  ;;  %v1685_v59 = vpack.c.bf16 %v1617_v55, %v1615_v8  ;;  %v1481_v6 = vadd.f32 %v1480_v20, %v3754_v43 }
 0x286   :  { %v1482_v31 = vpop.f32.mrf.mxu1  ;;  %v1888_v32 = vpop.f32.mrf.mxu0 }
 0x287   :  { %v1686_v21 = vpack.c.bf16 %v1618_v44, %v1616_v46  ;;  %v2697_v42 = vpack.c.bf16 %v1888_v32, %v1885_v30  ;;  %v1483_v36 = vadd.f32 %v1482_v31, %v3750_v3  ;;  %v1619_v33 = vmax.f32 %v1481_v6, 0.0 }
 0x288   :  { %v1484_v7 = vpop.f32.mrf.mxu1  ;;  %v1890_v15 = vpop.f32.mrf.mxu0 }
 0x289   :  { %2837 = vst [vmem:[%s4030_s6 + $0x20] sm:$0xff] %v2697_v42   ;;  %v1485_v39 = vadd.f32 %v1484_v7, %v3754_v43  ;;  %2083 = vmatprep.mubr.bf16.mxu0 %v1686_v21  ;;  %v1620_v48 = vmax.f32 %v1483_v36, 0.0 }
 0x28a   :  { %v1486_v23 = vpop.f32.mrf.mxu1  ;;  %v1893_v12 = vpop.f32.mrf.mxu0  ;;  %2084 = vmatmul.mubr.bf16.gmra.mxu0 %v1685_v59 }
 0x28b   :  { %v1487_v40 = vadd.f32 %v1486_v23, %v3750_v3  ;;  %v1621_v56 = vmax.f32 %v1485_v39, 0.0 }
 0x28c   :  { %v1490_v24 = vpop.f32.mrf.mxu1  ;;  %v1895_v26 = vpop.f32.mrf.mxu0 }
 0x28d   :  { %v1622_v37 = vmax.f32 %v1487_v40, 0.0  ;;  %v1687_v2 = vpack.c.bf16 %v1621_v56, %v1619_v33  ;;  %v1491_v17 = vadd.f32 %v1490_v24, %v3754_v43 }
 0x28e   :  { %v1492_v34 = vpop.f32.mrf.mxu1  ;;  %v1896_v62 = vpop.f32.mrf.mxu0 }
 0x28f   :  { %v1688_v51 = vpack.c.bf16 %v1622_v37, %v1620_v48  ;;  %v2702_v18 = vpack.c.bf16 %v1896_v62, %v1893_v12  ;;  %v1493_v57 = vadd.f32 %v1492_v34, %v3750_v3  ;;  %v1623_v47 = vmax.f32 %v1491_v17, 0.0 }
 0x290   :  { %v1494_v29 = vpop.f32.mrf.mxu1  ;;  %v1898_v1 = vpop.f32.mrf.mxu0 }
 0x291   :  { %2838 = vst [vmem:[%s4030_s6 + $0x28] sm:$0xff] %v2702_v18   ;;  %v1495_v58 = vadd.f32 %v1494_v29, %v3754_v43  ;;  %2091 = vmatprep.mubr.bf16.mxu0 %v1688_v51  ;;  %v1624_v19 = vmax.f32 %v1493_v57, 0.0 }
 0x292   :  { %v1496_v22 = vpop.f32.mrf.mxu1  ;;  %v1901_v16 = vpop.f32.mrf.mxu0  ;;  %2092 = vmatmul.mubr.bf16.gmra.mxu0 %v1687_v2 }
 0x293   :  { %v1497_v52 = vadd.f32 %v1496_v22, %v3750_v3  ;;  %v1625_v9 = vmax.f32 %v1495_v58, 0.0 }
 0x294   :  { %v1903_v11 = vpop.f32.mrf.mxu0 }
 0x295   :  { %v1626_v13 = vmax.f32 %v1497_v52, 0.0  ;;  %v1689_v25 = vpack.c.bf16 %v1625_v9, %v1623_v47 }
 0x296   :  { %v1904_v4 = vpop.f32.mrf.mxu0 }
 0x297   :  { %v1690_v53 = vpack.c.bf16 %v1626_v13, %v1624_v19  ;;  %v2707_v28 = vpack.c.bf16 %v1904_v4, %v1901_v16 }
 0x298   :  { %v1906_v54 = vpop.f32.mrf.mxu0 }
 0x299   :  { %2839 = vst [vmem:[%s4030_s6 + $0x30] sm:$0xff] %v2707_v28   ;;  %2099 = vmatprep.mubr.bf16.mxu0 %v1690_v53 }
 0x29a   :  { %v1909_v43 = vpop.f32.mrf.mxu0  ;;  %2100 = vmatmul.mubr.bf16.gmra.mxu0 %v1689_v25 }
 0x29c   :  { %v1911_v60 = vpop.f32.mrf.mxu0 }
 0x29e   :  { %v1912_v49 = vpop.f32.mrf.mxu0 }
 0x29f   :  { %v2712_v3 = vpack.c.bf16 %v1912_v49, %v1909_v43 }
 0x2a0   :  { %v1914_v45 = vpop.f32.mrf.mxu0 }
 0x2a1   :  { %2840 = vst [vmem:[%s4030_s6 + $0x38] sm:$0xff] %v2712_v3  }
 0x2a2   :  { %v1917_v41 = vpop.f32.mrf.mxu0 }
 0x2a4   :  { %v1919_v27 = vpop.f32.mrf.mxu0 }
 0x2a6   :  { %v1920_v63 = vpop.f32.mrf.mxu0 }
 0x2a7   :  { %v2717_v50 = vpack.c.bf16 %v1920_v63, %v1917_v41 }
 0x2a8   :  { %v1922_v5 = vpop.f32.mrf.mxu0 }
 0x2a9   :  { %2841 = vst [vmem:[%s4030_s6 + $0x40] sm:$0xff] %v2717_v50  }
 0x2aa   :  { %v1925_v35 = vpop.f32.mrf.mxu0 }
 0x2ac   :  { %v1927_v14 = vpop.f32.mrf.mxu0 }
 0x2ae   :  { %v1928_v61 = vpop.f32.mrf.mxu0 }
 0x2af   :  { %v2722_v38 = vpack.c.bf16 %v1928_v61, %v1925_v35 }
 0x2b0   :  { %v1930_v30 = vpop.f32.mrf.mxu0 }
 0x2b1   :  { %2842 = vst [vmem:[%s4030_s6 + $0x48] sm:$0xff] %v2722_v38  }
 0x2b2   :  { %v1933_v10 = vpop.f32.mrf.mxu0 }
 0x2b4   :  { %v1935_v55 = vpop.f32.mrf.mxu0 }
 0x2b6   :  { %v1936_v20 = vpop.f32.mrf.mxu0 }
 0x2b7   :  { %v2727_v0 = vpack.c.bf16 %v1936_v20, %v1933_v10 }
 0x2b8   :  { %v1938_v46 = vpop.f32.mrf.mxu0 }
 0x2b9   :  { %2843 = vst [vmem:[%s4030_s6 + $0x50] sm:$0xff] %v2727_v0  }
 0x2ba   :  { %v1941_v44 = vpop.f32.mrf.mxu0 }
 0x2bc   :  { %v1943_v8 = vpop.f32.mrf.mxu0 }
 0x2be   :  { %v1944_v31 = vpop.f32.mrf.mxu0 }
 0x2bf   :  { %v2732_v32 = vpack.c.bf16 %v1944_v31, %v1941_v44 }
 0x2c0   :  { %v1946_v21 = vpop.f32.mrf.mxu0 }
 0x2c1   :  { %2844 = vst [vmem:[%s4030_s6 + $0x58] sm:$0xff] %v2732_v32  }
 0x2c2   :  { %v1949_v42 = vpop.f32.mrf.mxu0 }
 0x2c4   :  { %v1951_v59 = vpop.f32.mrf.mxu0 }
 0x2c6   :  { %v1952_v7 = vpop.f32.mrf.mxu0 }
 0x2c7   :  { %v2737_v15 = vpack.c.bf16 %v1952_v7, %v1949_v42 }
 0x2c8   :  { %v1954_v36 = vpop.f32.mrf.mxu0 }
 0x2c9   :  { %2845 = vst [vmem:[%s4030_s6 + $0x60] sm:$0xff] %v2737_v15  }
 0x2ca   :  { %v1957_v39 = vpop.f32.mrf.mxu0 }
 0x2cc   :  { %v1959_v6 = vpop.f32.mrf.mxu0 }
 0x2ce   :  { %v1960_v23 = vpop.f32.mrf.mxu0 }
 0x2cf   :  { %v2742_v12 = vpack.c.bf16 %v1960_v23, %v1957_v39 }
 0x2d0   :  { %v1962_v40 = vpop.f32.mrf.mxu0 }
 0x2d1   :  { %2846 = vst [vmem:[%s4030_s6 + $0x68] sm:$0xff] %v2742_v12  }
 0x2d2   :  { %v1965_v56 = vpop.f32.mrf.mxu0 }
 0x2d4   :  { %v1967_v24 = vpop.f32.mrf.mxu0 }
 0x2d6   :  { %v1968_v26 = vpop.f32.mrf.mxu0 }
 0x2d7   :  { %v2747_v48 = vpack.c.bf16 %v1968_v26, %v1965_v56 }
 0x2d8   :  { %v1970_v37 = vpop.f32.mrf.mxu0 }
 0x2d9   :  { %2847 = vst [vmem:[%s4030_s6 + $0x70] sm:$0xff] %v2747_v48  }
 0x2da   :  { %v1973_v33 = vpop.f32.mrf.mxu0 }
 0x2dc   :  { %v1975_v34 = vpop.f32.mrf.mxu0 }
 0x2de   :  { %v1976_v62 = vpop.f32.mrf.mxu0 }
 0x2df   :  { %v2752_v51 = vpack.c.bf16 %v1976_v62, %v1973_v33 }
 0x2e0   :  { %v1978_v18 = vpop.f32.mrf.mxu0 }
 0x2e1   :  { %2848 = vst [vmem:[%s4030_s6 + $0x78] sm:$0xff] %v2752_v51  }
 0x2e2   :  { %v1981_v2 = vpop.f32.mrf.mxu0 }
 0x2e4   :  { %v1983_v29 = vpop.f32.mrf.mxu0 }
 0x2e6   :  { %v1984_v1 = vpop.f32.mrf.mxu0 }
 0x2e7   :  { %v2757_v57 = vpack.c.bf16 %v1984_v1, %v1981_v2 }
 0x2e8   :  { %v1986_v58 = vpop.f32.mrf.mxu0 }
 0x2e9   :  { %2849 = vst [vmem:[%s4030_s6 + $0x80] sm:$0xff] %v2757_v57  }
 0x2ea   :  { %v1989_v17 = vpop.f32.mrf.mxu0 }
 0x2ec   :  { %v1991_v22 = vpop.f32.mrf.mxu0 }
 0x2ee   :  { %v1992_v16 = vpop.f32.mrf.mxu0 }
 0x2ef   :  { %v2762_v52 = vpack.c.bf16 %v1992_v16, %v1989_v17 }
 0x2f0   :  { %v1994_v9 = vpop.f32.mrf.mxu0 }
 0x2f1   :  { %2850 = vst [vmem:[%s4030_s6 + $0x88] sm:$0xff] %v2762_v52  }
 0x2f2   :  { %v1997_v11 = vpop.f32.mrf.mxu0 }
 0x2f4   :  { %v1999_v19 = vpop.f32.mrf.mxu0 }
 0x2f6   :  { %v2000_v13 = vpop.f32.mrf.mxu0 }
 0x2f7   :  { %v2767_v47 = vpack.c.bf16 %v2000_v13, %v1997_v11 }
 0x2f8   :  { %v2002_v4 = vpop.f32.mrf.mxu0 }
 0x2f9   :  { %2851 = vst [vmem:[%s4030_s6 + $0x90] sm:$0xff] %v2767_v47  }
 0x2fa   :  { %v2005_v53 = vpop.f32.mrf.mxu0 }
 0x2fc   :  { %v2007_v28 = vpop.f32.mrf.mxu0 }
 0x2fe   :  { %v2008_v25 = vpop.f32.mrf.mxu0 }
 0x2ff   :  { %v2772_v54 = vpack.c.bf16 %v2008_v25, %v2005_v53 }
 0x300   :  { %v2010_v43 = vpop.f32.mrf.mxu0 }
 0x301   :  { %2852 = vst [vmem:[%s4030_s6 + $0x98] sm:$0xff] %v2772_v54  }
 0x302   :  { %v2013_v60 = vpop.f32.mrf.mxu0 }
 0x304   :  { %v2015_v49 = vpop.f32.mrf.mxu0 }
 0x306   :  { %v2016_v3 = vpop.f32.mrf.mxu0 }
 0x307   :  { %v2777_v45 = vpack.c.bf16 %v2016_v3, %v2013_v60 }
 0x308   :  { %v2018_v41 = vpop.f32.mrf.mxu0 }
 0x309   :  { %2853 = vst [vmem:[%s4030_s6 + $0xa0] sm:$0xff] %v2777_v45  }
 0x30a   :  { %v2021_v27 = vpop.f32.mrf.mxu0 }
 0x30c   :  { %v2023_v63 = vpop.f32.mrf.mxu0 }
 0x30e   :  { %v2024_v50 = vpop.f32.mrf.mxu0 }
 0x30f   :  { %v2782_v5 = vpack.c.bf16 %v2024_v50, %v2021_v27 }
 0x310   :  { %v2026_v35 = vpop.f32.mrf.mxu0 }
 0x311   :  { %2854 = vst [vmem:[%s4030_s6 + $0xa8] sm:$0xff] %v2782_v5  }
 0x312   :  { %v2029_v14 = vpop.f32.mrf.mxu0 }
 0x314   :  { %v2031_v61 = vpop.f32.mrf.mxu0 }
 0x316   :  { %v2032_v38 = vpop.f32.mrf.mxu0 }
 0x317   :  { %v2787_v30 = vpack.c.bf16 %v2032_v38, %v2029_v14 }
 0x318   :  { %v2034_v10 = vpop.f32.mrf.mxu0 }
 0x319   :  { %2855 = vst [vmem:[%s4030_s6 + $0xb0] sm:$0xff] %v2787_v30  }
 0x31a   :  { %v2037_v55 = vpop.f32.mrf.mxu0 }
 0x31c   :  { %v2039_v20 = vpop.f32.mrf.mxu0 }
 0x31e   :  { %v2040_v0 = vpop.f32.mrf.mxu0 }
 0x31f   :  { %v2792_v46 = vpack.c.bf16 %v2040_v0, %v2037_v55 }
 0x320   :  { %v2042_v44 = vpop.f32.mrf.mxu0 }
 0x321   :  { %2856 = vst [vmem:[%s4030_s6 + $0xb8] sm:$0xff] %v2792_v46  }
 0x322   :  { %v2045_v8 = vpop.f32.mrf.mxu0 }
 0x324   :  { %v2047_v31 = vpop.f32.mrf.mxu0 }
 0x326   :  { %v2048_v32 = vpop.f32.mrf.mxu0 }
 0x327   :  { %v2797_v21 = vpack.c.bf16 %v2048_v32, %v2045_v8 }
 0x328   :  { %v2050_v42 = vpop.f32.mrf.mxu0 }
 0x329   :  { %2857 = vst [vmem:[%s4030_s6 + $0xc0] sm:$0xff] %v2797_v21  }
 0x32a   :  { %v2053_v59 = vpop.f32.mrf.mxu0 }
 0x32c   :  { %v2055_v7 = vpop.f32.mrf.mxu0 }
 0x32e   :  { %v2056_v15 = vpop.f32.mrf.mxu0 }
 0x32f   :  { %v2802_v36 = vpack.c.bf16 %v2056_v15, %v2053_v59 }
 0x330   :  { %v2058_v39 = vpop.f32.mrf.mxu0 }
 0x331   :  { %2858 = vst [vmem:[%s4030_s6 + $0xc8] sm:$0xff] %v2802_v36  }
 0x332   :  { %v2061_v6 = vpop.f32.mrf.mxu0 }
 0x334   :  { %v2063_v23 = vpop.f32.mrf.mxu0 }
 0x336   :  { %v2064_v12 = vpop.f32.mrf.mxu0 }
 0x337   :  { %v2807_v40 = vpack.c.bf16 %v2064_v12, %v2061_v6 }
 0x338   :  { %v2066_v56 = vpop.f32.mrf.mxu0 }
 0x339   :  { %2859 = vst [vmem:[%s4030_s6 + $0xd0] sm:$0xff] %v2807_v40  }
 0x33a   :  { %v2069_v24 = vpop.f32.mrf.mxu0 }
 0x33c   :  { %v2071_v26 = vpop.f32.mrf.mxu0 }
 0x33e   :  { %v2072_v48 = vpop.f32.mrf.mxu0 }
 0x33f   :  { %v2812_v37 = vpack.c.bf16 %v2072_v48, %v2069_v24 }
 0x340   :  { %v2074_v33 = vpop.f32.mrf.mxu0 }
 0x341   :  { %2860 = vst [vmem:[%s4030_s6 + $0xd8] sm:$0xff] %v2812_v37  }
 0x342   :  { %v2077_v34 = vpop.f32.mrf.mxu0 }
 0x344   :  { %v2079_v62 = vpop.f32.mrf.mxu0 }
 0x346   :  { %v2080_v51 = vpop.f32.mrf.mxu0 }
 0x347   :  { %v2817_v18 = vpack.c.bf16 %v2080_v51, %v2077_v34 }
 0x348   :  { %v2082_v2 = vpop.f32.mrf.mxu0 }
 0x349   :  { %2861 = vst [vmem:[%s4030_s6 + $0xe0] sm:$0xff] %v2817_v18  }
 0x34a   :  { %v2085_v29 = vpop.f32.mrf.mxu0 }
 0x34c   :  { %v2087_v1 = vpop.f32.mrf.mxu0 }
 0x34e   :  { %v2088_v57 = vpop.f32.mrf.mxu0 }
 0x34f   :  { %v2822_v58 = vpack.c.bf16 %v2088_v57, %v2085_v29 }
 0x350   :  { %v2090_v17 = vpop.f32.mrf.mxu0 }
 0x351   :  { %2862 = vst [vmem:[%s4030_s6 + $0xe8] sm:$0xff] %v2822_v58  }
 0x352   :  { %v2093_v22 = vpop.f32.mrf.mxu0 }
 0x354   :  { %v2095_v16 = vpop.f32.mrf.mxu0 }
 0x356   :  { %v2096_v52 = vpop.f32.mrf.mxu0 }
 0x357   :  { %v2827_v9 = vpack.c.bf16 %v2096_v52, %v2093_v22 }
 0x358   :  { %v2098_v11 = vpop.f32.mrf.mxu0 }
 0x359   :  { %2863 = vst [vmem:[%s4030_s6 + $0xf0] sm:$0xff] %v2827_v9  }
 0x35a   :  { %v2101_v19 = vpop.f32.mrf.mxu0 }
 0x35c   :  { %v2103_v13 = vpop.f32.mrf.mxu0 }
 0x35e   :  { %v2104_v47 = vpop.f32.mrf.mxu0 }
 0x35f   :  { %v2832_v4 = vpack.c.bf16 %v2104_v47, %v2101_v19 }
 0x360   :  { %v2106_v53 = vpop.f32.mrf.mxu0 }
 0x361   :  { %2864 = vst [vmem:[%s4030_s6 + $0xf8] sm:$0xff] %v2832_v4  }

</bundles_post_ra>
